<compile_context>
chip_gen: v5e
topology: v5e:2x2
jax: 0.10.0
libtpu: 0.0.40
codegen_flags: <defaults>
</compile_context>

<pallas_src>
import jax
import jax.numpy as jnp
from jax import lax
from jax.experimental import pallas as pl
from jax.experimental.pallas import tpu as pltpu

D = 32            # synthetic decoder_embed_dim (real esm_if1 uses 512)
FFN = 4 * D       # = 128
DP = 128          # lane-dense padded hidden dim
FFN_PAD = 128     # lane-dense padded FFN dim (FFN == 128 already)
COORD_FEAT = 9    # 3 backbone atoms x 3 xyz coords
KPAD = 16         # padded coord-feature dim
GROUP = 8         # batch items fused per grid step (multiple of 8 sublanes)


def _layer_norm_padded(x, gamma, beta, eps=1e-5):
    """LayerNorm over the REAL D lanes of a zero-padded (N, DP) f32 tile.

    Padded lanes of x are zero, so sum(x)/D and sum(x*x)/D are exact statistics of
    the real columns.  gamma/beta are zero in the padded lanes, so the output's
    padded lanes stay exactly zero (keeps the zero-pad invariant for later matmuls).
    """
    s = jnp.sum(x, axis=-1, keepdims=True)
    ss = jnp.sum(x * x, axis=-1, keepdims=True)
    mu = s * (1.0 / D)
    var = ss * (1.0 / D) - mu * mu
    return (x - mu) * lax.rsqrt(var + eps) * gamma + beta


def esmif_encoder_kernel(coords_ref, mask_ref,
                         w_in_ref, b_in_ref, wqkv_ref, wo_ref,
                         ln1_g_ref, ln1_b_ref, ln2_g_ref, ln2_b_ref,
                         w1_ref, b1_ref, w2_ref, b2_ref,
                         out_ref):
    G, L, K = coords_ref.shape

    # ---- input embedding: (G*L, KPAD) @ (KPAD, DP), bf16 in / f32 accumulate ----
    x = coords_ref[...].astype(jnp.bfloat16).reshape(G * L, K)
    h = jnp.dot(x, w_in_ref[...], preferred_element_type=jnp.float32) + b_in_ref[...]

    # ---- pre-LN self-attention (single head over the real D lanes) ----
    hn = _layer_norm_padded(h, ln1_g_ref[...], ln1_b_ref[...])
    # Fused QKV projection: one (G*L, DP) @ (DP, 3*DP) matmul; 1/sqrt(D) folded into wq.
    qkv = jnp.dot(hn.astype(jnp.bfloat16), wqkv_ref[...],
                  preferred_element_type=jnp.float32).astype(jnp.bfloat16)
    q = qkv[:, :DP].reshape(G, L, DP)
    k = qkv[:, DP:2 * DP].reshape(G, L, DP)
    v = qkv[:, 2 * DP:].reshape(G, L, DP)

    # Batched scores (G, L, L): contract last dims directly (no XLU transpose of k).
    scores = lax.dot_general(q, k, (((2,), (2,)), ((0,), (0,))),
                             preferred_element_type=jnp.float32)
    # Length mask on the key axis: padded residues / dummy batch items get a -1e30 bias.
    key_mask = mask_ref[...]                                   # (G, L), 1.0 valid / 0.0 pad
    scores = scores + (key_mask[:, None, :] - 1.0) * 1e30
    scores = scores - jnp.max(scores, axis=-1, keepdims=True)
    p = jnp.exp(scores)
    p = p * pl.reciprocal(jnp.sum(p, axis=-1, keepdims=True), approx=True)

    attn = lax.dot_general(p.astype(jnp.bfloat16), v, (((2,), (1,)), ((0,), (0,))),
                           preferred_element_type=jnp.float32)  # (G, L, DP)
    attn = jnp.dot(attn.reshape(G * L, DP).astype(jnp.bfloat16), wo_ref[...],
                   preferred_element_type=jnp.float32)
    h = h + attn

    # ---- pre-LN feed-forward ----
    hn2 = _layer_norm_padded(h, ln2_g_ref[...], ln2_b_ref[...])
    f = jnp.dot(hn2.astype(jnp.bfloat16), w1_ref[...],
                preferred_element_type=jnp.float32) + b1_ref[...]
    # TODO(synk): PyTorch nn.GELU defaults to erf; tanh-approx gelu (EUP) used for the surrogate.
    f = jax.nn.gelu(f, approximate=True)
    f = jnp.dot(f.astype(jnp.bfloat16), w2_ref[...],
                preferred_element_type=jnp.float32) + b2_ref[...]
    h = h + f

    # ---- masked mean pooling over residues -> (G, DP) lane-dense, unmasked store ----
    hg = h.reshape(G, L, DP) * key_mask[:, :, None]
    lens = jnp.sum(key_mask, axis=-1, keepdims=True)            # (G, 1)
    out_ref[...] = jnp.sum(hg, axis=1) / jnp.maximum(lens, 1.0)


def esmif_encode_batch(coords_batch, lengths, prepared, group=GROUP):
    """coords_batch: (B, L, 3, 3) f32 (zero-padded past each item's real length),
    lengths: (B,) int -> (B, D) f32 pooled embeddings."""
    B, L = coords_batch.shape[0], coords_batch.shape[1]
    G = group
    B_pad = ((B + G - 1) // G) * G
    L_pad = max(8, ((L + 7) // 8) * 8)

    cf = coords_batch.reshape(B, L, COORD_FEAT).astype(jnp.float32)
    cf = jnp.pad(cf, ((0, B_pad - B), (0, L_pad - L), (0, KPAD - COORD_FEAT)))

    lens = jnp.pad(jnp.asarray(lengths, jnp.int32), (0, B_pad - B))
    mask = (jnp.arange(L_pad, dtype=jnp.int32)[None, :] < lens[:, None]).astype(jnp.float32)

    weight_args = (prepared['w_in'], prepared['b_in'], prepared['wqkv'], prepared['wo'],
                   prepared['ln1_g'], prepared['ln1_b'],
                   prepared['ln2_g'], prepared['ln2_b'],
                   prepared['w1'], prepared['b1'], prepared['w2'], prepared['b2'])

    # coords/mask/out: per-batch-group block.  Weights: constant block index ->
    # fetched once and VMEM-resident across all grid steps.
    in_specs = [pl.BlockSpec((G, L_pad, KPAD), lambda b: (b, 0, 0)),
                pl.BlockSpec((G, L_pad), lambda b: (b, 0))]
    in_specs += [pl.BlockSpec(w.shape, lambda b: (0, 0)) for w in weight_args]

    out_padded = pl.pallas_call(
        esmif_encoder_kernel,
        out_shape=jax.ShapeDtypeStruct((B_pad, DP), jnp.float32),
        grid=(B_pad // G,),
        in_specs=in_specs,
        out_specs=pl.BlockSpec((G, DP), lambda b: (b, 0)),
        compiler_params=pltpu.CompilerParams(
            dimension_semantics=("parallel",)),
    )(cf, mask, *weight_args)
    return out_padded[:B, :D]


def esmif_tower_forward(coords, prepared, group=GROUP):
    """Mirrors ESMIFEncoder.forward pooling path:
       single (L, 3, 3) tensor -> (1, D); list of tensors (possibly ragged lengths)
       -> (B, D) via one masked pallas_call (concat-along-dim-0 semantics)."""
    if isinstance(coords, (list, tuple)):
        items = [jnp.asarray(c, jnp.float32) for c in coords]
    else:
        items = [jnp.asarray(coords, jnp.float32)]
    lengths = [int(c.shape[0]) for c in items]
    l_max = max(lengths)
    batch = jnp.stack(
        [jnp.pad(c, ((0, l_max - c.shape[0]), (0, 0), (0, 0))) for c in items], axis=0)
    return esmif_encode_batch(batch, jnp.asarray(lengths, jnp.int32), prepared, group=group)


def init_params(key):
    ks = jax.random.split(key, 8)
    n = lambda k, shape, s: jax.random.normal(k, shape, dtype=jnp.float32) * s
    return {
        'w_in': n(ks[0], (COORD_FEAT, D), 0.30),
        'b_in': jnp.zeros((1, D), jnp.float32),
        'wq':   n(ks[1], (D, D), 0.125),
        'wk':   n(ks[2], (D, D), 0.125),
        'wv':   n(ks[3], (D, D), 0.125),
        'wo':   n(ks[4], (D, D), 0.125),
        'ln1_g': jnp.ones((1, D), jnp.float32),
        'ln1_b': jnp.zeros((1, D), jnp.float32),
        'ln2_g': jnp.ones((1, D), jnp.float32),
        'ln2_b': jnp.zeros((1, D), jnp.float32),
        'w1':   n(ks[5], (D, FFN), 0.125),
        'b1':   jnp.zeros((1, FFN), jnp.float32),
        'w2':   n(ks[6], (FFN, D), 0.0625),
        'b2':   jnp.zeros((1, D), jnp.float32),
    }


def prepare_params(p):
    """Zero-pad weights to lane-dense shapes, fold 1/sqrt(D) into wq, fuse Q/K/V into one
    (DP, 3*DP) weight, and store matmul weights as bf16 (biases / LN params stay f32)."""
    def pad2(a, rows, cols):
        r, c = a.shape
        return jnp.pad(a, ((0, rows - r), (0, cols - c)))

    inv_sqrt_d = 1.0 / (D ** 0.5)
    wq = pad2(p['wq'] * inv_sqrt_d, DP, DP)
    wk = pad2(p['wk'], DP, DP)
    wv = pad2(p['wv'], DP, DP)
    return {
        'w_in': pad2(p['w_in'], KPAD, DP).astype(jnp.bfloat16),
        'b_in': pad2(p['b_in'], 1, DP),
        'wqkv': jnp.concatenate([wq, wk, wv], axis=1).astype(jnp.bfloat16),   # (DP, 3*DP)
        'wo':   pad2(p['wo'], DP, DP).astype(jnp.bfloat16),
        # gamma/beta padded with ZEROS so padded lanes stay zero after LayerNorm.
        'ln1_g': pad2(p['ln1_g'], 1, DP),
        'ln1_b': pad2(p['ln1_b'], 1, DP),
        'ln2_g': pad2(p['ln2_g'], 1, DP),
        'ln2_b': pad2(p['ln2_b'], 1, DP),
        'w1':   pad2(p['w1'], DP, FFN_PAD).astype(jnp.bfloat16),
        'b1':   pad2(p['b1'], 1, FFN_PAD),
        'w2':   pad2(p['w2'], FFN_PAD, DP).astype(jnp.bfloat16),
        'b2':   pad2(p['b2'], 1, DP),
    }


if __name__ == "__main__":
    key = jax.random.PRNGKey(0)
    k_coords, k_params = jax.random.split(key)

    L = 8  # sequence length (number of residues)
    coords = jax.random.normal(k_coords, (L, 3, 3), dtype=jnp.float32)
    params = init_params(k_params)
    prepared = prepare_params(params)

    # single-structure path of forward(): (L, 3, 3) -> (1, D)
    out = esmif_tower_forward(coords, prepared)
    out = jax.block_until_ready(out)
    assert out.shape == (1, D) and out.dtype == jnp.float32

    # list-batch path (ragged lengths): one masked pallas_call, concat-along-dim-0 semantics
    coords_short = jax.random.normal(jax.random.PRNGKey(1), (6, 3, 3), dtype=jnp.float32)
    out_batch = esmif_tower_forward([coords, coords * 0.5, coords_short], prepared)
    out_batch = jax.block_until_ready(out_batch)
    assert out_batch.shape == (3, D) and out_batch.dtype == jnp.float32

    print("KERNEL_OK")
</pallas_src>

<mosaic_0001>
module attributes {stable_mosaic.version = 11 : i64} {
  func.func @esmif_encoder_kernel(%arg0: i32, %arg1: memref<8x8x16xf32, #tpu.memory_space<vmem>>, %arg2: memref<8x8xf32, #tpu.memory_space<vmem>>, %arg3: memref<16x128xbf16, #tpu.memory_space<vmem>>, %arg4: memref<1x128xf32, #tpu.memory_space<vmem>>, %arg5: memref<128x384xbf16, #tpu.memory_space<vmem>>, %arg6: memref<128x128xbf16, #tpu.memory_space<vmem>>, %arg7: memref<1x128xf32, #tpu.memory_space<vmem>>, %arg8: memref<1x128xf32, #tpu.memory_space<vmem>>, %arg9: memref<1x128xf32, #tpu.memory_space<vmem>>, %arg10: memref<1x128xf32, #tpu.memory_space<vmem>>, %arg11: memref<128x128xbf16, #tpu.memory_space<vmem>>, %arg12: memref<1x128xf32, #tpu.memory_space<vmem>>, %arg13: memref<128x128xbf16, #tpu.memory_space<vmem>>, %arg14: memref<1x128xf32, #tpu.memory_space<vmem>>, %arg15: memref<8x128xf32, #tpu.memory_space<vmem>>) attributes {dimension_semantics = [#tpu.dimension_semantics<parallel>], iteration_bounds = array<i64: 1>, scalar_prefetch = 0 : i64, scratch_operands = 0 : i64, tpu.core_type = #tpu.core_type<tc>, window_params = [{transform_indices = @transform_0, window_bounds = array<i64: 8, 8, 16>}, {transform_indices = @transform_1, window_bounds = array<i64: 8, 8>}, {pipeline_mode = #tpu.pipeline_mode<synchronous>, transform_indices = @transform_2, window_bounds = array<i64: 16, 128>}, {pipeline_mode = #tpu.pipeline_mode<synchronous>, transform_indices = @transform_3, window_bounds = array<i64: 1, 128>}, {pipeline_mode = #tpu.pipeline_mode<synchronous>, transform_indices = @transform_4, window_bounds = array<i64: 128, 384>}, {pipeline_mode = #tpu.pipeline_mode<synchronous>, transform_indices = @transform_5, window_bounds = array<i64: 128, 128>}, {pipeline_mode = #tpu.pipeline_mode<synchronous>, transform_indices = @transform_6, window_bounds = array<i64: 1, 128>}, {pipeline_mode = #tpu.pipeline_mode<synchronous>, transform_indices = @transform_7, window_bounds = array<i64: 1, 128>}, {pipeline_mode = #tpu.pipeline_mode<synchronous>, transform_indices = @transform_8, window_bounds = array<i64: 1, 128>}, {pipeline_mode = #tpu.pipeline_mode<synchronous>, transform_indices = @transform_9, window_bounds = array<i64: 1, 128>}, {pipeline_mode = #tpu.pipeline_mode<synchronous>, transform_indices = @transform_10, window_bounds = array<i64: 128, 128>}, {pipeline_mode = #tpu.pipeline_mode<synchronous>, transform_indices = @transform_11, window_bounds = array<i64: 1, 128>}, {pipeline_mode = #tpu.pipeline_mode<synchronous>, transform_indices = @transform_12, window_bounds = array<i64: 128, 128>}, {pipeline_mode = #tpu.pipeline_mode<synchronous>, transform_indices = @transform_13, window_bounds = array<i64: 1, 128>}, {transform_indices = @transform_14, window_bounds = array<i64: 8, 128>}]} {
    %c0 = arith.constant 0 : index
    %c0_0 = arith.constant 0 : index
    %c0_1 = arith.constant 0 : index
    %0 = vector.load %arg1[%c0, %c0_0, %c0_1] : memref<8x8x16xf32, #tpu.memory_space<vmem>>, vector<8x8x16xf32>
    %1 = arith.truncf %0 : vector<8x8x16xf32> to vector<8x8x16xbf16>
    %2 = vector.shape_cast %1 : vector<8x8x16xbf16> to vector<64x16xbf16>
    %c0_2 = arith.constant 0 : index
    %c0_3 = arith.constant 0 : index
    %3 = vector.load %arg3[%c0_2, %c0_3] : memref<16x128xbf16, #tpu.memory_space<vmem>>, vector<16x128xbf16>
    %cst = arith.constant dense<0.000000e+00> : vector<64x128xf32>
    %4 = tpu.matmul %2, %3, %cst {dimension_numbers = #tpu.dot_dimension_numbers<[1], [0], [0], [1], [0, 0, 1, 1], [], []>} : vector<64x16xbf16>, vector<16x128xbf16>, vector<64x128xf32> -> vector<64x128xf32>
    %c0_4 = arith.constant 0 : index
    %c0_5 = arith.constant 0 : index
    %5 = vector.load %arg4[%c0_4, %c0_5] : memref<1x128xf32, #tpu.memory_space<vmem>>, vector<1x128xf32>
    %6 = vector.broadcast %5 : vector<1x128xf32> to vector<64x128xf32>
    %7 = arith.addf %4, %6 : vector<64x128xf32>
    %c0_6 = arith.constant 0 : index
    %c0_7 = arith.constant 0 : index
    %8 = vector.load %arg7[%c0_6, %c0_7] : memref<1x128xf32, #tpu.memory_space<vmem>>, vector<1x128xf32>
    %c0_8 = arith.constant 0 : index
    %c0_9 = arith.constant 0 : index
    %9 = vector.load %arg8[%c0_8, %c0_9] : memref<1x128xf32, #tpu.memory_space<vmem>>, vector<1x128xf32>
    %cst_10 = arith.constant dense<0.000000e+00> : vector<64xf32>
    %10 = vector.multi_reduction <add>, %7, %cst_10 [1] : vector<64x128xf32> to vector<64xf32>
    %11 = vector.shape_cast %10 : vector<64xf32> to vector<64x1xf32>
    %12 = arith.mulf %7, %7 : vector<64x128xf32>
    %cst_11 = arith.constant dense<0.000000e+00> : vector<64xf32>
    %13 = vector.multi_reduction <add>, %12, %cst_11 [1] : vector<64x128xf32> to vector<64xf32>
    %14 = vector.shape_cast %13 : vector<64xf32> to vector<64x1xf32>
    %cst_12 = arith.constant 3.125000e-02 : f32
    %15 = vector.broadcast %cst_12 : f32 to vector<64x1xf32>
    %16 = arith.mulf %11, %15 : vector<64x1xf32>
    %cst_13 = arith.constant 3.125000e-02 : f32
    %17 = vector.broadcast %cst_13 : f32 to vector<64x1xf32>
    %18 = arith.mulf %14, %17 : vector<64x1xf32>
    %19 = arith.mulf %16, %16 : vector<64x1xf32>
    %20 = arith.subf %18, %19 : vector<64x1xf32>
    %21 = vector.broadcast %16 : vector<64x1xf32> to vector<64x128xf32>
    %22 = arith.subf %7, %21 : vector<64x128xf32>
    %cst_14 = arith.constant 9.99999974E-6 : f32
    %23 = vector.broadcast %cst_14 : f32 to vector<64x1xf32>
    %24 = arith.addf %20, %23 : vector<64x1xf32>
    %25 = math.rsqrt %24 : vector<64x1xf32>
    %26 = vector.broadcast %25 : vector<64x1xf32> to vector<64x128xf32>
    %27 = arith.mulf %22, %26 : vector<64x128xf32>
    %28 = vector.broadcast %8 : vector<1x128xf32> to vector<64x128xf32>
    %29 = arith.mulf %27, %28 : vector<64x128xf32>
    %30 = vector.broadcast %9 : vector<1x128xf32> to vector<64x128xf32>
    %31 = arith.addf %29, %30 : vector<64x128xf32>
    %32 = arith.truncf %31 : vector<64x128xf32> to vector<64x128xbf16>
    %c0_15 = arith.constant 0 : index
    %c0_16 = arith.constant 0 : index
    %33 = vector.load %arg5[%c0_15, %c0_16] : memref<128x384xbf16, #tpu.memory_space<vmem>>, vector<128x384xbf16>
    %cst_17 = arith.constant dense<0.000000e+00> : vector<64x384xf32>
    %34 = tpu.matmul %32, %33, %cst_17 {dimension_numbers = #tpu.dot_dimension_numbers<[1], [0], [0], [1], [0, 0, 1, 1], [], []>} : vector<64x128xbf16>, vector<128x384xbf16>, vector<64x384xf32> -> vector<64x384xf32>
    %35 = arith.truncf %34 : vector<64x384xf32> to vector<64x384xbf16>
    %36 = vector.extract_strided_slice %35 {offsets = [0, 0], sizes = [64, 128], strides = [1, 1]} : vector<64x384xbf16> to vector<64x128xbf16>
    %37 = vector.shape_cast %36 : vector<64x128xbf16> to vector<8x8x128xbf16>
    %38 = vector.extract_strided_slice %35 {offsets = [0, 128], sizes = [64, 128], strides = [1, 1]} : vector<64x384xbf16> to vector<64x128xbf16>
    %39 = vector.shape_cast %38 : vector<64x128xbf16> to vector<8x8x128xbf16>
    %40 = vector.extract_strided_slice %35 {offsets = [0, 256], sizes = [64, 128], strides = [1, 1]} : vector<64x384xbf16> to vector<64x128xbf16>
    %41 = vector.shape_cast %40 : vector<64x128xbf16> to vector<8x8x128xbf16>
    %cst_18 = arith.constant dense<0.000000e+00> : vector<8x8x8xf32>
    %42 = tpu.matmul %37, %39, %cst_18 {dimension_numbers = #tpu.dot_dimension_numbers<[2], [2], [1], [1], [0, 0, 0, 1, 1, 1], [0], [0]>} : vector<8x8x128xbf16>, vector<8x8x128xbf16>, vector<8x8x8xf32> -> vector<8x8x8xf32>
    %c0_19 = arith.constant 0 : index
    %c0_20 = arith.constant 0 : index
    %43 = vector.load %arg2[%c0_19, %c0_20] : memref<8x8xf32, #tpu.memory_space<vmem>>, vector<8x8xf32>
    %44 = vector.shape_cast %43 : vector<8x8xf32> to vector<8x1x8xf32>
    %cst_21 = arith.constant 1.000000e+00 : f32
    %45 = vector.broadcast %cst_21 : f32 to vector<8x1x8xf32>
    %46 = arith.subf %44, %45 : vector<8x1x8xf32>
    %cst_22 = arith.constant 1.000000e+30 : f32
    %47 = vector.broadcast %cst_22 : f32 to vector<8x1x8xf32>
    %48 = arith.mulf %46, %47 : vector<8x1x8xf32>
    %49 = vector.broadcast %48 : vector<8x1x8xf32> to vector<8x8x8xf32>
    %50 = arith.addf %42, %49 : vector<8x8x8xf32>
    %cst_23 = arith.constant dense<0xFF800000> : vector<8x8xf32>
    %51 = vector.multi_reduction <maximumf>, %50, %cst_23 [2] : vector<8x8x8xf32> to vector<8x8xf32>
    %52 = vector.shape_cast %51 : vector<8x8xf32> to vector<8x8x1xf32>
    %53 = vector.broadcast %52 : vector<8x8x1xf32> to vector<8x8x8xf32>
    %54 = arith.subf %50, %53 : vector<8x8x8xf32>
    %55 = math.exp %54 : vector<8x8x8xf32>
    %cst_24 = arith.constant dense<0.000000e+00> : vector<8x8xf32>
    %56 = vector.multi_reduction <add>, %55, %cst_24 [2] : vector<8x8x8xf32> to vector<8x8xf32>
    %57 = vector.shape_cast %56 : vector<8x8xf32> to vector<8x8x1xf32>
    %58 = tpu.reciprocal %57 {approx = true} : vector<8x8x1xf32> -> vector<8x8x1xf32>
    %59 = vector.broadcast %58 : vector<8x8x1xf32> to vector<8x8x8xf32>
    %60 = arith.mulf %55, %59 : vector<8x8x8xf32>
    %61 = arith.truncf %60 : vector<8x8x8xf32> to vector<8x8x8xbf16>
    %cst_25 = arith.constant dense<0.000000e+00> : vector<8x8x128xf32>
    %62 = tpu.matmul %61, %41, %cst_25 {dimension_numbers = #tpu.dot_dimension_numbers<[2], [1], [1], [2], [0, 0, 0, 1, 1, 2], [0], [0]>} : vector<8x8x8xbf16>, vector<8x8x128xbf16>, vector<8x8x128xf32> -> vector<8x8x128xf32>
    %63 = vector.shape_cast %62 : vector<8x8x128xf32> to vector<64x128xf32>
    %64 = arith.truncf %63 : vector<64x128xf32> to vector<64x128xbf16>
    %c0_26 = arith.constant 0 : index
    %c0_27 = arith.constant 0 : index
    %65 = vector.load %arg6[%c0_26, %c0_27] : memref<128x128xbf16, #tpu.memory_space<vmem>>, vector<128x128xbf16>
    %cst_28 = arith.constant dense<0.000000e+00> : vector<64x128xf32>
    %66 = tpu.matmul %64, %65, %cst_28 {dimension_numbers = #tpu.dot_dimension_numbers<[1], [0], [0], [1], [0, 0, 1, 1], [], []>} : vector<64x128xbf16>, vector<128x128xbf16>, vector<64x128xf32> -> vector<64x128xf32>
    %67 = arith.addf %7, %66 : vector<64x128xf32>
    %c0_29 = arith.constant 0 : index
    %c0_30 = arith.constant 0 : index
    %68 = vector.load %arg9[%c0_29, %c0_30] : memref<1x128xf32, #tpu.memory_space<vmem>>, vector<1x128xf32>
    %c0_31 = arith.constant 0 : index
    %c0_32 = arith.constant 0 : index
    %69 = vector.load %arg10[%c0_31, %c0_32] : memref<1x128xf32, #tpu.memory_space<vmem>>, vector<1x128xf32>
    %cst_33 = arith.constant dense<0.000000e+00> : vector<64xf32>
    %70 = vector.multi_reduction <add>, %67, %cst_33 [1] : vector<64x128xf32> to vector<64xf32>
    %71 = vector.shape_cast %70 : vector<64xf32> to vector<64x1xf32>
    %72 = arith.mulf %67, %67 : vector<64x128xf32>
    %cst_34 = arith.constant dense<0.000000e+00> : vector<64xf32>
    %73 = vector.multi_reduction <add>, %72, %cst_34 [1] : vector<64x128xf32> to vector<64xf32>
    %74 = vector.shape_cast %73 : vector<64xf32> to vector<64x1xf32>
    %cst_35 = arith.constant 3.125000e-02 : f32
    %75 = vector.broadcast %cst_35 : f32 to vector<64x1xf32>
    %76 = arith.mulf %71, %75 : vector<64x1xf32>
    %cst_36 = arith.constant 3.125000e-02 : f32
    %77 = vector.broadcast %cst_36 : f32 to vector<64x1xf32>
    %78 = arith.mulf %74, %77 : vector<64x1xf32>
    %79 = arith.mulf %76, %76 : vector<64x1xf32>
    %80 = arith.subf %78, %79 : vector<64x1xf32>
    %81 = vector.broadcast %76 : vector<64x1xf32> to vector<64x128xf32>
    %82 = arith.subf %67, %81 : vector<64x128xf32>
    %cst_37 = arith.constant 9.99999974E-6 : f32
    %83 = vector.broadcast %cst_37 : f32 to vector<64x1xf32>
    %84 = arith.addf %80, %83 : vector<64x1xf32>
    %85 = math.rsqrt %84 : vector<64x1xf32>
    %86 = vector.broadcast %85 : vector<64x1xf32> to vector<64x128xf32>
    %87 = arith.mulf %82, %86 : vector<64x128xf32>
    %88 = vector.broadcast %68 : vector<1x128xf32> to vector<64x128xf32>
    %89 = arith.mulf %87, %88 : vector<64x128xf32>
    %90 = vector.broadcast %69 : vector<1x128xf32> to vector<64x128xf32>
    %91 = arith.addf %89, %90 : vector<64x128xf32>
    %92 = arith.truncf %91 : vector<64x128xf32> to vector<64x128xbf16>
    %c0_38 = arith.constant 0 : index
    %c0_39 = arith.constant 0 : index
    %93 = vector.load %arg11[%c0_38, %c0_39] : memref<128x128xbf16, #tpu.memory_space<vmem>>, vector<128x128xbf16>
    %cst_40 = arith.constant dense<0.000000e+00> : vector<64x128xf32>
    %94 = tpu.matmul %92, %93, %cst_40 {dimension_numbers = #tpu.dot_dimension_numbers<[1], [0], [0], [1], [0, 0, 1, 1], [], []>} : vector<64x128xbf16>, vector<128x128xbf16>, vector<64x128xf32> -> vector<64x128xf32>
    %c0_41 = arith.constant 0 : index
    %c0_42 = arith.constant 0 : index
    %95 = vector.load %arg12[%c0_41, %c0_42] : memref<1x128xf32, #tpu.memory_space<vmem>>, vector<1x128xf32>
    %96 = vector.broadcast %95 : vector<1x128xf32> to vector<64x128xf32>
    %97 = arith.addf %94, %96 : vector<64x128xf32>
    %98 = arith.mulf %97, %97 : vector<64x128xf32>
    %99 = arith.mulf %97, %98 : vector<64x128xf32>
    %cst_43 = arith.constant 4.471500e-02 : f32
    %100 = vector.broadcast %cst_43 : f32 to vector<64x128xf32>
    %101 = arith.mulf %100, %99 : vector<64x128xf32>
    %102 = arith.addf %97, %101 : vector<64x128xf32>
    %cst_44 = arith.constant 0.797884583 : f32
    %103 = vector.broadcast %cst_44 : f32 to vector<64x128xf32>
    %104 = arith.mulf %103, %102 : vector<64x128xf32>
    %105 = math.tanh %104 : vector<64x128xf32>
    %cst_45 = arith.constant 1.000000e+00 : f32
    %106 = vector.broadcast %cst_45 : f32 to vector<64x128xf32>
    %107 = arith.addf %106, %105 : vector<64x128xf32>
    %cst_46 = arith.constant 5.000000e-01 : f32
    %108 = vector.broadcast %cst_46 : f32 to vector<64x128xf32>
    %109 = arith.mulf %108, %107 : vector<64x128xf32>
    %110 = arith.mulf %97, %109 : vector<64x128xf32>
    %111 = arith.truncf %110 : vector<64x128xf32> to vector<64x128xbf16>
    %c0_47 = arith.constant 0 : index
    %c0_48 = arith.constant 0 : index
    %112 = vector.load %arg13[%c0_47, %c0_48] : memref<128x128xbf16, #tpu.memory_space<vmem>>, vector<128x128xbf16>
    %cst_49 = arith.constant dense<0.000000e+00> : vector<64x128xf32>
    %113 = tpu.matmul %111, %112, %cst_49 {dimension_numbers = #tpu.dot_dimension_numbers<[1], [0], [0], [1], [0, 0, 1, 1], [], []>} : vector<64x128xbf16>, vector<128x128xbf16>, vector<64x128xf32> -> vector<64x128xf32>
    %c0_50 = arith.constant 0 : index
    %c0_51 = arith.constant 0 : index
    %114 = vector.load %arg14[%c0_50, %c0_51] : memref<1x128xf32, #tpu.memory_space<vmem>>, vector<1x128xf32>
    %115 = vector.broadcast %114 : vector<1x128xf32> to vector<64x128xf32>
    %116 = arith.addf %113, %115 : vector<64x128xf32>
    %117 = arith.addf %67, %116 : vector<64x128xf32>
    %118 = vector.shape_cast %117 : vector<64x128xf32> to vector<8x8x128xf32>
    %119 = vector.shape_cast %43 : vector<8x8xf32> to vector<8x8x1xf32>
    %120 = vector.broadcast %119 : vector<8x8x1xf32> to vector<8x8x128xf32>
    %121 = arith.mulf %118, %120 : vector<8x8x128xf32>
    %cst_52 = arith.constant dense<0.000000e+00> : vector<8xf32>
    %122 = vector.multi_reduction <add>, %43, %cst_52 [1] : vector<8x8xf32> to vector<8xf32>
    %123 = vector.shape_cast %122 : vector<8xf32> to vector<8x1xf32>
    %cst_53 = arith.constant dense<0.000000e+00> : vector<8x128xf32>
    %124 = vector.multi_reduction <add>, %121, %cst_53 [1] : vector<8x8x128xf32> to vector<8x128xf32>
    %cst_54 = arith.constant 1.000000e+00 : f32
    %125 = vector.broadcast %cst_54 : f32 to vector<8x1xf32>
    %126 = arith.maximumf %123, %125 : vector<8x1xf32>
    %127 = vector.broadcast %126 : vector<8x1xf32> to vector<8x128xf32>
    %128 = arith.divf %124, %127 : vector<8x128xf32>
    %c0_55 = arith.constant 0 : index
    %c0_56 = arith.constant 0 : index
    %129 = vector.load %arg15[%c0_55, %c0_56] : memref<8x128xf32, #tpu.memory_space<vmem>>, vector<8x128xf32>
    tpu.vector_store %arg15[%c0_55, %c0_56], %128 {strides = array<i32>} : memref<8x128xf32, #tpu.memory_space<vmem>>, vector<8x128xf32>,
    return
  }
  func.func @transform_0(%arg0: i32) -> (i32, i32, i32) {
    %c0_i32 = arith.constant 0 : i32
    %c0_i32_0 = arith.constant 0 : i32
    %c0_i32_1 = arith.constant 0 : i32
    return %arg0, %c0_i32, %c0_i32_0 : i32, i32, i32
  }
  func.func @transform_1(%arg0: i32) -> (i32, i32) {
    %c0_i32 = arith.constant 0 : i32
    %c0_i32_0 = arith.constant 0 : i32
    return %arg0, %c0_i32 : i32, i32
  }
  func.func @transform_2(%arg0: i32) -> (i32, i32) {
    %c0_i32 = arith.constant 0 : i32
    %c0_i32_0 = arith.constant 0 : i32
    %c0_i32_1 = arith.constant 0 : i32
    return %c0_i32, %c0_i32_0 : i32, i32
  }
  func.func @transform_3(%arg0: i32) -> (i32, i32) {
    %c0_i32 = arith.constant 0 : i32
    %c0_i32_0 = arith.constant 0 : i32
    %c0_i32_1 = arith.constant 0 : i32
    return %c0_i32, %c0_i32_0 : i32, i32
  }
  func.func @transform_4(%arg0: i32) -> (i32, i32) {
    %c0_i32 = arith.constant 0 : i32
    %c0_i32_0 = arith.constant 0 : i32
    %c0_i32_1 = arith.constant 0 : i32
    return %c0_i32, %c0_i32_0 : i32, i32
  }
  func.func @transform_5(%arg0: i32) -> (i32, i32) {
    %c0_i32 = arith.constant 0 : i32
    %c0_i32_0 = arith.constant 0 : i32
    %c0_i32_1 = arith.constant 0 : i32
    return %c0_i32, %c0_i32_0 : i32, i32
  }
  func.func @transform_6(%arg0: i32) -> (i32, i32) {
    %c0_i32 = arith.constant 0 : i32
    %c0_i32_0 = arith.constant 0 : i32
    %c0_i32_1 = arith.constant 0 : i32
    return %c0_i32, %c0_i32_0 : i32, i32
  }
  func.func @transform_7(%arg0: i32) -> (i32, i32) {
    %c0_i32 = arith.constant 0 : i32
    %c0_i32_0 = arith.constant 0 : i32
    %c0_i32_1 = arith.constant 0 : i32
    return %c0_i32, %c0_i32_0 : i32, i32
  }
  func.func @transform_8(%arg0: i32) -> (i32, i32) {
    %c0_i32 = arith.constant 0 : i32
    %c0_i32_0 = arith.constant 0 : i32
    %c0_i32_1 = arith.constant 0 : i32
    return %c0_i32, %c0_i32_0 : i32, i32
  }
  func.func @transform_9(%arg0: i32) -> (i32, i32) {
    %c0_i32 = arith.constant 0 : i32
    %c0_i32_0 = arith.constant 0 : i32
    %c0_i32_1 = arith.constant 0 : i32
    return %c0_i32, %c0_i32_0 : i32, i32
  }
  func.func @transform_10(%arg0: i32) -> (i32, i32) {
    %c0_i32 = arith.constant 0 : i32
    %c0_i32_0 = arith.constant 0 : i32
    %c0_i32_1 = arith.constant 0 : i32
    return %c0_i32, %c0_i32_0 : i32, i32
  }
  func.func @transform_11(%arg0: i32) -> (i32, i32) {
    %c0_i32 = arith.constant 0 : i32
    %c0_i32_0 = arith.constant 0 : i32
    %c0_i32_1 = arith.constant 0 : i32
    return %c0_i32, %c0_i32_0 : i32, i32
  }
  func.func @transform_12(%arg0: i32) -> (i32, i32) {
    %c0_i32 = arith.constant 0 : i32
    %c0_i32_0 = arith.constant 0 : i32
    %c0_i32_1 = arith.constant 0 : i32
    return %c0_i32, %c0_i32_0 : i32, i32
  }
  func.func @transform_13(%arg0: i32) -> (i32, i32) {
    %c0_i32 = arith.constant 0 : i32
    %c0_i32_0 = arith.constant 0 : i32
    %c0_i32_1 = arith.constant 0 : i32
    return %c0_i32, %c0_i32_0 : i32, i32
  }
  func.func @transform_14(%arg0: i32) -> (i32, i32) {
    %c0_i32 = arith.constant 0 : i32
    %c0_i32_0 = arith.constant 0 : i32
    return %arg0, %c0_i32 : i32, i32
  }
}

</mosaic_0001>

<bundles_post_ra>
// kernel: tpu_custom_call.1
= control target key start
LH: loop header
LB: loop body
LE: loop exit
PB: predicated region body
PF: predicated region fallthrough
CT: control target
= control target key end

     0   :  { %19 = vsyncpa [#allocation3], 0  ;;  %s3371_s0 = inlined_call_operand.hbm [shape: f32[8,8,16], index: 0, kind: input, shape index: {}]   ;;  %s3372_s1 = inlined_call_operand.hbm [shape: f32[8,8], index: 1, kind: input, shape index: {}]   ;;  %s3373_s2 = inlined_call_operand.hbm [shape: bf16[16,128], index: 2, kind: input, shape index: {}]   ;;  %s3374_s3 = inlined_call_operand.vmem [shape: f32[1,128], index: 3, kind: input, shape index: {}]   ;;  %s3375_s4 = inlined_call_operand.hbm [shape: bf16[128,384], index: 4, kind: input, shape index: {}]   ;;  %s3376_s5 = inlined_call_operand.hbm [shape: bf16[128,128], index: 5, kind: input, shape index: {}]   ;;  %s3377_s6 = inlined_call_operand.vmem [shape: f32[1,128], index: 6, kind: input, shape index: {}]   ;;  %s3378_s7 = inlined_call_operand.vmem [shape: f32[1,128], index: 7, kind: input, shape index: {}]   ;;  %s3379_s8 = inlined_call_operand.vmem [shape: f32[1,128], index: 8, kind: input, shape index: {}]   ;;  %s3380_s9 = inlined_call_operand.vmem [shape: f32[1,128], index: 9, kind: input, shape index: {}]   ;;  %s3381_s10 = inlined_call_operand.hbm [shape: bf16[128,128], index: 10, kind: input, shape index: {}]   ;;  %s3382_s11 = inlined_call_operand.vmem [shape: f32[1,128], index: 11, kind: input, shape index: {}]   ;;  %s3383_s12 = inlined_call_operand.hbm [shape: bf16[128,128], index: 12, kind: input, shape index: {}]   ;;  %s3384_s13 = inlined_call_operand.vmem [shape: f32[1,128], index: 13, kind: input, shape index: {}]   ;;  %s3385_s14 = inlined_call_operand.hbm [shape: f32[8,128], index: 14, kind: output, shape index: {}]  }
   0x1   :  { %20 = vsyncpa [#allocation6], 0 }
   0x2   :  { %21 = vsyncpa [#allocation9], 0 }
   0x3   :  { %22 = vsyncpa [#allocation12], 0  ;;  %s42_s15 = sshll.u32 %s3372_s1, 4  ;;  %s43_s15 = int_to_ptr.hbm [resolvable:$true] %s42_s15 }
   0x4   :  { %23 = vsyncpa [#allocation4], 0  ;;  %s2634_s16 = smov [#allocation5]   ;;  %s67_s20 = sshll.u32 %s3375_s4, 4  ;;  %s68_s20 = int_to_ptr.hbm [resolvable:$true] %s67_s20 }
   0x5   :  { %s44_s17 = sshll.u32 %s2634_s16, 4  ;;  %s2635_s21 = smov [#allocation8]   ;;  %s45_s17 = int_to_ptr.vmem [resolvable:$true] %s44_s17 }
   0x6   :  { %47 = dma.hbm_to_vmem [thread:$0]  %s43_s15, 128, %s45_s17, [#allocation6]  }
   0x7   :  { %s69_s22 = sshll.u32 %s2635_s21, 4  ;;  %s2636_s23 = smov 192   ;;  %s70_s22 = int_to_ptr.vmem [resolvable:$true] %s69_s22 }
   0x8   :  { %s2637_s24 = smov 12   ;;  %s101_s1 = sshll.u32 %s3381_s10, 4  ;;  %s102_s1 = int_to_ptr.hbm [resolvable:$true] %s101_s1 }
   0x9   :  { %75 = dma.hbm_to_vmem [thread:$0]  %s68_s20, 3072, %s70_s22, [#allocation9], %s2636_s23, %s2636_s23, %s2637_s24  }
   0xa   :  { %s2638_s27 = smov [#allocation11]   ;;  %s28_s4 = sshll.u32 %s3371_s0, 4  ;;  %s29_s4 = int_to_ptr.hbm [resolvable:$true] %s28_s4 }
   0xb   :  { %s103_s28 = sshll.u32 %s2638_s27, 4  ;;  %s2639_s15 = smov 64   ;;  %s104_s28 = int_to_ptr.vmem [resolvable:$true] %s103_s28 }
   0xc   :  { %s2640_s16 = smov 4   ;;  %s2641_s17 = smov [#allocation2]  }
   0xd   :  { %109 = dma.hbm_to_vmem [thread:$0]  %s102_s1, 1024, %s104_s28, [#allocation12], %s2639_s15, %s2639_s15, %s2640_s16  }
   0xe   :  { %s30_s18 = sshll.u32 %s2641_s17, 4  ;;  %s2642_s19 = smov 128   ;;  %s31_s18 = int_to_ptr.vmem [resolvable:$true] %s30_s18 }
   0xf   :  { %s2643_s10 = smov 8   ;;  %s52_s22 = sshll.u32 %s3373_s2, 4  ;;  %s53_s22 = int_to_ptr.hbm [resolvable:$true] %s52_s22 }
  0x10   :  { %36 = dma.hbm_to_vmem [thread:$0]  %s29_s4, 1024, %s31_s18, [#allocation3], %s2642_s19, %s2642_s19, %s2643_s10  }
  0x11   :  { %s2644_s23 = smov [#allocation7]   ;;  %s80_s26 = sshll.u32 %s3376_s5, 4  ;;  %s81_s26 = int_to_ptr.hbm [resolvable:$true] %s80_s26 }
  0x12   :  { %s54_s0 = sshll.u32 %s2644_s23, 4  ;;  %s2645_s1 = smov [#allocation10]   ;;  %s55_s0 = int_to_ptr.vmem [resolvable:$true] %s54_s0 }
  0x13   :  { %60 = dma.hbm_to_vmem [thread:$0]  %s53_s22, 128, %s55_s0, [#allocation6], %s2639_s15, %s2639_s15, %s2640_s16  }
  0x14   :  { %s82_s27 = sshll.u32 %s2645_s1, 4  ;;  %s116_s30 = sshll.u32 %s3383_s12, 4  ;;  %s83_s27 = int_to_ptr.vmem [resolvable:$true] %s82_s27  ;;  %s117_s30 = int_to_ptr.hbm [resolvable:$true] %s116_s30 }
  0x15   :  { %88 = dma.hbm_to_vmem [thread:$0]  %s81_s26, 1024, %s83_s27, [#allocation9], %s2639_s15, %s2639_s15, %s2640_s16  }
  0x16   :  { %s2646_s2 = smov [#allocation13]  }
  0x17   :  { %s118_s4 = sshll.u32 %s2646_s2, 4  ;;  %s119_s4 = int_to_ptr.vmem [resolvable:$true] %s118_s4 }
  0x18   :  { %124 = dma.hbm_to_vmem [thread:$0]  %s117_s30, 1024, %s119_s4, [#allocation12], %s2639_s15, %s2639_s15, %s2640_s16  }
  0x19   :  { %2624 = dma.done.wait [#allocation3], 1024  }
  0x1a   :  { %2625 = vsyncadd [#allocation3], 4294966272 }
  0x1b   :  { %2626 = dma.done.wait [#allocation6], 256  }
  0x1c   :  { %2627 = vsyncadd [#allocation6], 4294967040 }
  0x1d   :  { %2628 = dma.done.wait [#allocation9], 4096  }
  0x1e   :  { %2629 = vsyncadd [#allocation9], 4294963200 }
  0x1f   :  { %2630 = dma.done.wait [#allocation12], 2048  }
  0x20   :  { %2631 = vsyncadd [#allocation12], 4294965248  ;;  %v2253_v0 = vld [vmem:[#allocation7] sm:$0xff]  ;;  %v158_v1 = vld [vmem:[#allocation2 + $0x10] sm:$0xff]  ;;  %vm204_vm0 = vcmask 130048   ;;  %s2024_s23 = sshll.u32 %s3385_s14, 4  ;;  %s2025_s23 = int_to_ptr.hbm [resolvable:$true] %s2024_s23 }
  0x21   :  { %v159_v2 = vld [vmem:[#allocation2 + $0x18] sm:$0xff]  ;;  %v166_v3 = vpack.c.bf16 %v158_v1, %v158_v1  ;;  %2302 = vmatpush.bf16.msra.mxu1 %v2253_v0  ;;  %224 = vmatpush.bf16.msra.mxu0 %v2253_v0  ;;  %v156_v5 = vld [vmem:[#allocation2] sm:$0xff]  ;;  %v157_v6 = vld [vmem:[#allocation2 + $0x8] sm:$0xff] }
  0x22   :  { %v167_v4 = vpack.c.bf16 %v159_v2, %v159_v2  ;;  %v164_v9 = vpack.c.bf16 %v156_v5, %v156_v5  ;;  %v165_v10 = vpack.c.bf16 %v157_v6, %v157_v6  ;;  %v160_v14 = vld [vmem:[#allocation2 + $0x20] sm:$0xff]  ;;  %v161_v15 = vld [vmem:[#allocation2 + $0x28] sm:$0xff]  ;;  %v162_v22 = vld [vmem:[#allocation2 + $0x30] sm:$0xff] }
  0x23   :  { %v188_v7 = vunpack.c.l.b16 %v166_v3  ;;  %v168_v17 = vpack.c.bf16 %v160_v14, %v160_v14  ;;  %v169_v18 = vpack.c.bf16 %v161_v15, %v161_v15  ;;  %v163_v23 = vld [vmem:[#allocation2 + $0x38] sm:$0xff]  ;;  %v170_v24 = vpack.c.bf16 %v162_v22, %v162_v22  ;;  %v2328_v29 = vld [vmem:[%s3374_s3] ss:$0 sm:$0xff]  ;;  %v2276_v55 = vld [vmem:[#allocation8 + $0xb0] sm:$0xf0] }
  0x24   :  { %v189_v8 = vunpack.c.l.b16 %v167_v4  ;;  %v186_v12 = vunpack.c.l.b16 %v164_v9  ;;  %v187_v13 = vunpack.c.l.b16 %v165_v10  ;;  %v171_v25 = vpack.c.bf16 %v163_v23, %v163_v23  ;;  %v2131_v54 = vld [vmem:[#allocation8 + $0xa8] sm:$0xf]  ;;  %v2119_v57 = vld [vmem:[#allocation8 + $0x90] sm:$0xf]  ;;  %v2273_v58 = vld [vmem:[#allocation8 + $0x98] sm:$0xf0] }
  0x25   :  { %v190_v19 = vunpack.c.l.b16 %v168_v17  ;;  %v191_v20 = vunpack.c.l.b16 %v169_v18  ;;  %v192_v26 = vunpack.c.l.b16 %v170_v24  ;;  %v2132_v56 = vor.u32 %v2276_v55, %v2131_v54  ;;  %v2107_v60 = vld [vmem:[#allocation8 + $0x78] sm:$0xf]  ;;  %v2270_v61 = vld [vmem:[#allocation8 + $0x80] sm:$0xf0]  ;;  %v2095_v63 = vld [vmem:[#allocation8 + $0x60] sm:$0xf] }
  0x26   :  { %v195_v11 = vpack.c.b16 %v189_v8, %v188_v7  ;;  %v194_v16 = vpack.c.b16 %v187_v13, %v186_v12  ;;  %v193_v27 = vunpack.c.l.b16 %v171_v25  ;;  %v2120_v59 = vor.u32 %v2273_v58, %v2119_v57  ;;  %v2267_v0 = vld [vmem:[#allocation8 + $0x68] sm:$0xf0]  ;;  %v2083_v2 = vld [vmem:[#allocation8 + $0x48] sm:$0xf]  ;;  %v2264_v3 = vld [vmem:[#allocation8 + $0x50] sm:$0xf0] }
  0x27   :  { %v196_v21 = vpack.c.b16 %v191_v20, %v190_v19  ;;  %2303 = vmatpush.bf16.msra.mxu2 %v2132_v56  ;;  %610 = vmatpush.bf16.msrb.mxu1 %v2132_v56  ;;  %v2108_v62 = vor.u32 %v2270_v61, %v2107_v60  ;;  %v2096_v1 = vor.u32 %v2267_v0, %v2095_v63  ;;  %v2071_v5 = vld [vmem:[#allocation8 + $0x30] sm:$0xf]  ;;  %v2261_v6 = vld [vmem:[#allocation8 + $0x38] sm:$0xf0]  ;;  %v2059_v10 = vld [vmem:[#allocation8 + $0x18] sm:$0xf] }
  0x28   :  { %2042 = vmatmul.msk.bf16.vlgmr.msra.gmra.mxu1 %vm204_vm0, %v195_v11  ;;  %2041 = vmatmul.msk.bf16.vlgmr.msra.gmra.mxu0 %vm204_vm0, %v194_v16  ;;  %v197_v28 = vpack.c.b16 %v193_v27, %v192_v26  ;;  %v2084_v4 = vor.u32 %v2264_v3, %v2083_v2  ;;  %v2072_v7 = vor.u32 %v2261_v6, %v2071_v5  ;;  %v2258_v11 = vld [vmem:[#allocation8 + $0x20] sm:$0xf0]  ;;  %v2047_v17 = vld [vmem:[#allocation8] sm:$0xf]  ;;  %v2255_v18 = vld [vmem:[#allocation8 + $0x8] sm:$0xf0] }
  0x29   :  { %v2060_v13 = vor.u32 %v2258_v11, %v2059_v10  ;;  %v2048_v19 = vor.u32 %v2255_v18, %v2047_v17  ;;  %v2275_v58 = vld [vmem:[#allocation8 + $0xac] sm:$0xf]  ;;  %v2127_v2 = vld [vmem:[#allocation8 + $0x98] sm:$0xf]  ;;  %v2274_v3 = vld [vmem:[#allocation8 + $0xa0] sm:$0xf0] }
  0x2a   :  { %v2128_v6 = vor.u32 %v2274_v3, %v2127_v2  ;;  %v2121_v10 = vld [vmem:[#allocation8 + $0x9c] sm:$0xf0] }
  0x2b   :  { %2304 = vmatpush.bf16.msra.mxu2 %v2120_v59  ;;  %611 = vmatpush.bf16.msrb.mxu1 %v2120_v59  ;;  %v2133_v59 = vld [vmem:[#allocation8 + $0xb4] sm:$0xf0]  ;;  %v2115_v18 = vld [vmem:[#allocation8 + $0x80] sm:$0xf] }
  0x2f   :  { %2305 = vmatpush.bf16.msra.mxu2 %v2108_v62  ;;  %612 = vmatpush.bf16.msrb.mxu1 %v2108_v62 }
  0x33   :  { %2306 = vmatpush.bf16.msra.mxu2 %v2096_v1  ;;  %613 = vmatpush.bf16.msrb.mxu1 %v2096_v1  ;;  %v2136_v1 = vor.u32 %v2275_v58, %v2133_v59 }
  0x37   :  { %2307 = vmatpush.bf16.msra.mxu2 %v2084_v4  ;;  %614 = vmatpush.bf16.msrb.mxu1 %v2084_v4 }
  0x38   :  { %2043 = vmatmul.msk.bf16.gmra.mxu1 %vm204_vm0, %v196_v21 }
  0x3b   :  { %2308 = vmatpush.bf16.msra.mxu2 %v2072_v7  ;;  %615 = vmatpush.bf16.msrb.mxu1 %v2072_v7 }
  0x3f   :  { %2309 = vmatpush.bf16.msra.mxu2 %v2060_v13  ;;  %616 = vmatpush.bf16.msrb.mxu1 %v2060_v13 }
  0x43   :  { %2310 = vmatpush.bf16.msra.mxu2 %v2048_v19  ;;  %617 = vmatpush.bf16.msrb.mxu1 %v2048_v19  ;;  %v2271_v19 = vld [vmem:[#allocation8 + $0x88] sm:$0xf0] }
  0x47   :  { %639 = vmatpush.bf16.msrb.mxu2 %v2136_v1 }
  0x48   :  { %2044 = vmatmul.msk.bf16.gmra.mxu1 %vm204_vm0, %v197_v28 }
  0xa5   :  { %v231_v30 = vpop.f32.mrf.mxu1  ;;  %v226_v42 = vpop.f32.mrf.mxu0 }
  0xa6   :  { %v2763_v31 = vadd.f32 %v2328_v29, %v231_v30  ;;  %v2795_v51 = vadd.f32 %v2328_v29, %v226_v42 }
  0xa8   :  { %252 = vadd.xlane.f32.xlu0 %v2763_v31  ;;  %v266_v32 = vmul.f32 %v2763_v31, %v2763_v31  ;;  %v264_v52 = vmul.f32 %v2795_v51, %v2795_v51 }
  0xaa   :  { %276 = vadd.xlane.f32.xlu1 %v266_v32 }
  0xad   :  { %v233_v33 = vpop.f32.mrf.mxu1  ;;  %v228_v46 = vpop.f32.mrf.mxu0 }
  0xae   :  { %v2768_v34 = vadd.f32 %v2328_v29, %v233_v33  ;;  %v2790_v49 = vadd.f32 %v2328_v29, %v228_v46  ;;  %v2139_v46 = vld [vmem:[#allocation8 + $0xb0] sm:$0xf] }
  0xb0   :  { %254 = vadd.xlane.f32.xlu0 %v2768_v34  ;;  %v267_v35 = vmul.f32 %v2768_v34, %v2768_v34  ;;  %v265_v53 = vmul.f32 %v2790_v49, %v2790_v49 }
  0xb2   :  { %278 = vadd.xlane.f32.xlu1 %v267_v35 }
  0xb5   :  { %v236_v36 = vpop.f32.mrf.mxu1 }
  0xb6   :  { %v2773_v37 = vadd.f32 %v2328_v29, %v236_v36 }
  0xb8   :  { %256 = vadd.xlane.f32.xlu2 %v2773_v37  ;;  %v268_v38 = vmul.f32 %v2773_v37, %v2773_v37 }
  0xba   :  { %280 = vadd.xlane.f32.xlu0 %v268_v38 }
  0xbd   :  { %v238_v39 = vpop.f32.mrf.mxu1 }
  0xbe   :  { %v2778_v40 = vadd.f32 %v2328_v29, %v238_v39 }
  0xc0   :  { %258 = vadd.xlane.f32.xlu2 %v2778_v40  ;;  %v269_v41 = vmul.f32 %v2778_v40, %v2778_v40 }
  0xc2   :  { %282 = vadd.xlane.f32.xlu1 %v269_v41 }
  0xc5   :  { %v241_v43 = vpop.f32.mrf.mxu1 }
  0xc6   :  { %v2783_v44 = vadd.f32 %v2328_v29, %v241_v43 }
  0xc8   :  { %260 = vadd.xlane.f32.xlu2 %v2783_v44  ;;  %v270_v45 = vmul.f32 %v2783_v44, %v2783_v44 }
  0xca   :  { %284 = vadd.xlane.f32.xlu1 %v270_v45 }
  0xcd   :  { %v243_v47 = vpop.f32.mrf.mxu1 }
  0xce   :  { %v2788_v48 = vadd.f32 %v2328_v29, %v243_v47  ;;  %v2277_v47 = vld [vmem:[#allocation8 + $0xb8] sm:$0xf0] }
  0xcf   :  { %v2140_v54 = vor.u32 %v2277_v47, %v2139_v46 }
  0xd0   :  { %262 = vadd.xlane.f32.xlu0 %v2788_v48  ;;  %v271_v50 = vmul.f32 %v2788_v48, %v2788_v48 }
  0xd1   :  { %668 = vmatpush.bf16.msra.mxu3 %v2140_v54 }
  0xd2   :  { %286 = vadd.xlane.f32.xlu2 %v271_v50  ;;  %250 = vadd.xlane.f32.xlu1 %v2790_v49 }
  0xd5   :  { %669 = vmatpush.bf16.msra.mxu3 %v2128_v6  ;;  %v2085_v6 = vld [vmem:[#allocation8 + $0x54] sm:$0xf0] }
  0xd8   :  { %248 = vadd.xlane.f32.xlu0 %v2795_v51 }
  0xda   :  { %272 = vadd.xlane.f32.xlu2 %v264_v52 }
  0xe0   :  { %274 = vadd.xlane.f32.xlu0 %v265_v53 }
 0x11b   :  { %v253_v8 = vpop.xlane.xlu0 %252 }
 0x11c   :  { %v2803_v9 = vmul.f32 0.03125, %v253_v8  ;;  %v2272_v8 = vld [vmem:[#allocation8 + $0x94] sm:$0xf] }
 0x11d   :  { %v277_v12 = vpop.xlane.xlu1 %276 }
 0x11e   :  { %v306_v14 = vmul.f32 %v2803_v9, %v2803_v9  ;;  %v298_v15 = vmul.f32 0.03125, %v277_v12  ;;  %v322_v4 = vsub.f32 %v2763_v31, %v2803_v9 }
 0x120   :  { %v314_v16 = vsub.f32 %v298_v15, %v306_v14  ;;  %v2837_v14 = vld [vmem:[%s3377_s6] ss:$0 sm:$0xff]  ;;  %v2124_v15 = vor.u32 %v2272_v8, %v2121_v10 }
 0x122   :  { %v330_v20 = vadd.f32 1e-05, %v314_v16  ;;  %640 = vmatpush.bf16.msrb.mxu2 %v2124_v15 }
 0x123   :  { %v255_v21 = vpop.xlane.xlu0 %254 }
 0x124   :  { %2335 = vrsqrt.f32 %v330_v20  ;;  %v2807_v22 = vmul.f32 0.03125, %v255_v21  ;;  %vm362_vm2 = vweird.f32 %v330_v20 }
 0x125   :  { %v279_v23 = vpop.xlane.xlu1 %278 }
 0x126   :  { %v307_v24 = vmul.f32 %v2807_v22, %v2807_v22  ;;  %v299_v25 = vmul.f32 0.03125, %v279_v23  ;;  %v2116_v23 = vor.u32 %v2271_v19, %v2115_v18 }
 0x128   :  { %v315_v26 = vsub.f32 %v299_v25, %v307_v24  ;;  %670 = vmatpush.bf16.msra.mxu3 %v2116_v23  ;;  %v2260_v23 = vld [vmem:[#allocation8 + $0x34] sm:$0xf] }
 0x12a   :  { %v2336_v27 = vpop.eup %2335  ;;  %v331_v28 = vadd.f32 1e-05, %v315_v26 }
 0x12b   :  { %v357_v29 = vmul.f32 %v2336_v27, %v330_v20  ;;  %v257_v30 = vpop.xlane.xlu2 %256  ;;  %vm363_vm1 = vweird.f32 %v2336_v27  ;;  %v323_v20 = vsub.f32 %v2768_v34, %v2807_v22 }
 0x12c   :  { %2337 = vrsqrt.f32 %v331_v28  ;;  %v2811_v32 = vmul.f32 0.03125, %v257_v30  ;;  %vm2820_vm3 = vmor %vm362_vm2, %vm363_vm1  ;;  %vm372_vm5 = vweird.f32 %v331_v28 }
 0x12d   :  { %v358_v33 = vmul.f32 %v2336_v27, %v357_v29  ;;  %v281_v35 = vpop.xlane.xlu0 %280 }
 0x12e   :  { %v308_v36 = vmul.f32 %v2811_v32, %v2811_v32  ;;  %v300_v38 = vmul.f32 0.03125, %v281_v35  ;;  %v2854_v35 = vld [vmem:[%s3378_s7] ss:$0 sm:$0xff] }
 0x12f   :  { %v359_v39 = vmul.f32 0.5, %v358_v33 }
 0x130   :  { %v316_v41 = vsub.f32 %v300_v38, %v308_v36 }
 0x131   :  { %v360_v42 = vsub.f32 1.5, %v359_v39  ;;  %v2103_v39 = vld [vmem:[#allocation8 + $0x68] sm:$0xf] }
 0x132   :  { %v2338_v43 = vpop.eup %2337  ;;  %v2815_v45 = vadd.f32 1e-05, %v316_v41  ;;  %v2268_v41 = vld [vmem:[#allocation8 + $0x70] sm:$0xf0] }
 0x133   :  { %v361_v50 = vmul.f32 %v2336_v27, %v360_v42  ;;  %v367_v52 = vmul.f32 %v2338_v43, %v331_v28  ;;  %v259_v53 = vpop.xlane.xlu2 %258  ;;  %vm373_vm4 = vweird.f32 %v2338_v43  ;;  %v2109_v28 = vld [vmem:[#allocation8 + $0x84] sm:$0xf0]  ;;  %v2104_v46 = vor.u32 %v2268_v41, %v2103_v39 }
 0x134   :  { %2339 = vrsqrt.f32 %v2815_v45  ;;  %v2818_v55 = vmul.f32 0.03125, %v259_v53  ;;  %vm374_vm6 = vmor %vm372_vm5, %vm373_vm4  ;;  %vm382_vm8 = vweird.f32 %v2815_v45  ;;  %v2055_v41 = vld [vmem:[#allocation8 + $0x8] sm:$0xf] }
 0x135   :  { %v368_v56 = vmul.f32 %v2338_v43, %v367_v52  ;;  %v283_v57 = vpop.xlane.xlu1 %282  ;;  %v365_v63 = vsel %vm2820_vm3, %v2336_v27, %v361_v50  ;;  %v2269_v27 = vld [vmem:[#allocation8 + $0x7c] sm:$0xf]  ;;  %v2266_v50 = vld [vmem:[#allocation8 + $0x64] sm:$0xf]  ;;  %v2097_v52 = vld [vmem:[#allocation8 + $0x6c] sm:$0xf0]  ;;  %671 = vmatpush.bf16.msra.mxu3 %v2104_v46 }
 0x136   :  { %v309_v61 = vmul.f32 %v2818_v55, %v2818_v55  ;;  %v301_v62 = vmul.f32 0.03125, %v283_v57  ;;  %v418_v13 = vmul.f32 %v365_v63, %v322_v4  ;;  %v2112_v38 = vor.u32 %v2269_v27, %v2109_v28  ;;  %v2265_v63 = vld [vmem:[#allocation8 + $0x58] sm:$0xf0] }
 0x137   :  { %v369_v0 = vmul.f32 0.5, %v368_v56  ;;  %v2100_v58 = vor.u32 %v2266_v50, %v2097_v52  ;;  %v2256_v50 = vld [vmem:[#allocation8 + $0x10] sm:$0xf0] }
 0x138   :  { %v317_v5 = vsub.f32 %v301_v62, %v309_v61  ;;  %v429_v22 = vmul.f32 %v2837_v14, %v418_v13  ;;  %641 = vmatpush.bf16.msrb.mxu2 %v2112_v38  ;;  %v2091_v62 = vld [vmem:[#allocation8 + $0x50] sm:$0xf] }
 0x139   :  { %v370_v7 = vsub.f32 1.5, %v369_v0  ;;  %v2092_v4 = vor.u32 %v2265_v63, %v2091_v62  ;;  %v2056_v62 = vor.u32 %v2256_v50, %v2055_v41 }
 0x13a   :  { %v2830_v11 = vpop.eup %2339  ;;  %v2832_v12 = vadd.f32 1e-05, %v317_v5  ;;  %v440_v56 = vadd.f32 %v2854_v35, %v429_v22  ;;  %v2263_v5 = vld [vmem:[#allocation8 + $0x4c] sm:$0xf]  ;;  %v2257_v22 = vld [vmem:[#allocation8 + $0x1c] sm:$0xf] }
 0x13b   :  { %v371_v9 = vmul.f32 %v2338_v43, %v370_v7  ;;  %v377_v16 = vmul.f32 %v2830_v11, %v2815_v45  ;;  %v261_v17 = vpop.xlane.xlu2 %260  ;;  %vm383_vm7 = vweird.f32 %v2830_v11  ;;  %672 = vmatpush.bf16.msra.mxu3 %v2092_v4  ;;  %v2088_v15 = vor.u32 %v2263_v5, %v2085_v6 }
 0x13c   :  { %2341 = vrsqrt.f32 %v2832_v12  ;;  %v2845_v21 = vmul.f32 0.03125, %v261_v17  ;;  %642 = vmatpush.bf16.msrb.mxu2 %v2100_v58  ;;  %vm2876_vm9 = vmor %vm382_vm8, %vm383_vm7  ;;  %v324_v17 = vsub.f32 %v2773_v37, %v2811_v32  ;;  %vm392_vm11 = vweird.f32 %v2832_v12  ;;  %v2254_v58 = vld [vmem:[#allocation8 + $0x4] sm:$0xf] }
 0x13d   :  { %v375_v24 = vsel %vm374_vm6, %v2338_v43, %v371_v9  ;;  %v378_v25 = vmul.f32 %v2830_v11, %v377_v16  ;;  %v285_v26 = vpop.xlane.xlu1 %284  ;;  %v2079_v9 = vld [vmem:[#allocation8 + $0x38] sm:$0xf]  ;;  %v2262_v16 = vld [vmem:[#allocation8 + $0x40] sm:$0xf0] }
 0x13e   :  { %v310_v29 = vmul.f32 %v2845_v21, %v2845_v21  ;;  %v302_v30 = vmul.f32 0.03125, %v285_v26  ;;  %v419_v33 = vmul.f32 %v375_v24, %v323_v20  ;;  %v2080_v19 = vor.u32 %v2262_v16, %v2079_v9  ;;  %v2073_v24 = vld [vmem:[#allocation8 + $0x3c] sm:$0xf0] }
 0x13f   :  { %v379_v36 = vmul.f32 0.5, %v378_v25  ;;  %v2076_v27 = vor.u32 %v2260_v23, %v2073_v24  ;;  %v326_v23 = vsub.f32 %v2783_v44, %v2845_v21 }
 0x140   :  { %v318_v42 = vsub.f32 %v302_v30, %v310_v29  ;;  %v430_v43 = vmul.f32 %v2837_v14, %v419_v33  ;;  %643 = vmatpush.bf16.msrb.mxu2 %v2088_v15  ;;  %673 = vmatpush.bf16.msra.mxu3 %v2080_v19  ;;  %v2067_v30 = vld [vmem:[#allocation8 + $0x20] sm:$0xf]  ;;  %v2259_v33 = vld [vmem:[#allocation8 + $0x28] sm:$0xf0] }
 0x141   :  { %v380_v47 = vsub.f32 1.5, %v379_v36  ;;  %v325_v36 = vsub.f32 %v2778_v40, %v2818_v55  ;;  %v2068_v39 = vor.u32 %v2259_v33, %v2067_v30 }
 0x142   :  { %v2857_v53 = vpop.eup %2341  ;;  %v2859_v54 = vadd.f32 1e-05, %v318_v42  ;;  %v441_v57 = vadd.f32 %v2854_v35, %v430_v43 }
 0x143   :  { %v381_v59 = vmul.f32 %v2830_v11, %v380_v47  ;;  %v387_v60 = vmul.f32 %v2857_v53, %v2832_v12  ;;  %v263_v61 = vpop.xlane.xlu0 %262  ;;  %vm393_vm10 = vweird.f32 %v2857_v53  ;;  %v2061_v12 = vld [vmem:[#allocation8 + $0x24] sm:$0xf0] }
 0x144   :  { %2343 = vrsqrt.f32 %v2859_v54  ;;  %v2868_v0 = vmul.f32 0.03125, %v263_v61  ;;  %v2870_v1 = vpack.c.bf16 %v441_v57, %v440_v56  ;;  %vm394_vm12 = vmor %vm392_vm11, %vm393_vm10  ;;  %644 = vmatpush.bf16.msrb.mxu2 %v2076_v27  ;;  %v2064_v47 = vor.u32 %v2257_v22, %v2061_v12  ;;  %674 = vmatpush.bf16.msra.mxu3 %v2068_v39 }
 0x145   :  { %v388_v2 = vmul.f32 %v2857_v53, %v387_v60  ;;  %v287_v3 = vpop.xlane.xlu2 %286  ;;  %v385_v45 = vsel %vm2876_vm9, %v2830_v11, %v381_v59  ;;  %v2049_v59 = vld [vmem:[#allocation8 + $0xc] sm:$0xf0]  ;;  %v251_v61 = vpop.xlane.xlu1 %250  ;;  %vm402_vm14 = vweird.f32 %v2859_v54  ;;  %vm997_vm9 = vcmask 1043456  }
 0x146   :  { %v311_v8 = vmul.f32 %v2868_v0, %v2868_v0  ;;  %v303_v10 = vmul.f32 0.03125, %v287_v3  ;;  %623 = vmatmul.bf16.vlgmr.msra.gmra.mxu2 %v2870_v1  ;;  %v420_v11 = vmul.f32 %v385_v45, %v324_v17  ;;  %v2052_v3 = vor.u32 %v2254_v58, %v2049_v59 }
 0x147   :  { %v389_v13 = vmul.f32 0.5, %v388_v2  ;;  %v2910_v5 = vmul.f32 0.03125, %v251_v61  ;;  %vm897_vm10 = vcmask 64512  }
 0x148   :  { %v319_v18 = vsub.f32 %v303_v10, %v311_v8  ;;  %v431_v57 = vmul.f32 %v2837_v14, %v420_v11  ;;  %645 = vmatpush.bf16.msrb.mxu2 %v2064_v47  ;;  %675 = vmatpush.bf16.msra.mxu3 %v2056_v62 }
 0x149   :  { %v390_v20 = vsub.f32 1.5, %v389_v13  ;;  %v305_v15 = vmul.f32 %v2910_v5, %v2910_v5  ;;  %v321_v58 = vsub.f32 %v2790_v49, %v2910_v5 }
 0x14a   :  { %v2889_v25 = vpop.eup %2343  ;;  %v2891_v26 = vadd.f32 1e-05, %v319_v18  ;;  %v442_v7 = vadd.f32 %v2854_v35, %v431_v57 }
 0x14b   :  { %v391_v28 = vmul.f32 %v2857_v53, %v390_v20  ;;  %v397_v32 = vmul.f32 %v2889_v25, %v2859_v54  ;;  %v249_v29 = vpop.xlane.xlu0 %248  ;;  %vm403_vm13 = vweird.f32 %v2889_v25 }
 0x14c   :  { %2345 = vrsqrt.f32 %v2891_v26  ;;  %v2902_v38 = vmul.f32 0.03125, %v249_v29  ;;  %646 = vmatpush.bf16.msrb.mxu2 %v2052_v3  ;;  %vm404_vm15 = vmor %vm402_vm14, %vm403_vm13  ;;  %vm412_vm1 = vweird.f32 %v2891_v26  ;;  %v327_v29 = vsub.f32 %v2788_v48, %v2868_v0 }
 0x14d   :  { %v395_v42 = vsel %vm394_vm12, %v2857_v53, %v391_v28  ;;  %v398_v43 = vmul.f32 %v2889_v25, %v397_v32  ;;  %v273_v46 = vpop.xlane.xlu2 %272 }
 0x14e   :  { %v304_v55 = vmul.f32 %v2902_v38, %v2902_v38  ;;  %v296_v52 = vmul.f32 0.03125, %v273_v46  ;;  %v421_v56 = vmul.f32 %v395_v42, %v325_v36 }
 0x14f   :  { %v399_v60 = vmul.f32 0.5, %v398_v43 }
 0x150   :  { %v312_v53 = vsub.f32 %v296_v52, %v304_v55  ;;  %v432_v63 = vmul.f32 %v2837_v14, %v421_v56  ;;  %v320_v55 = vsub.f32 %v2795_v51, %v2902_v38 }
 0x151   :  { %v400_v2 = vsub.f32 1.5, %v399_v60 }
 0x152   :  { %v2346_v4 = vpop.eup %2345  ;;  %v328_v6 = vadd.f32 1e-05, %v312_v53  ;;  %v443_v8 = vadd.f32 %v2854_v35, %v432_v63 }
 0x153   :  { %v401_v10 = vmul.f32 %v2889_v25, %v400_v2  ;;  %v407_v45 = vmul.f32 %v2346_v4, %v2891_v26  ;;  %v275_v13 = vpop.xlane.xlu0 %274  ;;  %vm413_vm0 = vweird.f32 %v2346_v4 }
 0x154   :  { %2347 = vrsqrt.f32 %v328_v6  ;;  %v297_v9 = vmul.f32 0.03125, %v275_v13  ;;  %v448_v16 = vpack.c.bf16 %v443_v8, %v442_v7  ;;  %vm414_vm2 = vmor %vm412_vm1, %vm413_vm0  ;;  %vm342_vm4 = vweird.f32 %v328_v6 }
 0x155   :  { %v408_v17 = vmul.f32 %v2346_v4, %v407_v45  ;;  %v405_v19 = vsel %vm404_vm15, %v2889_v25, %v401_v10 }
 0x156   :  { %v313_v18 = vsub.f32 %v297_v9, %v305_v15  ;;  %628 = vmatmul.bf16.gmra.mxu2 %v448_v16  ;;  %v422_v28 = vmul.f32 %v405_v19, %v326_v23 }
 0x157   :  { %v409_v20 = vmul.f32 0.5, %v408_v17 }
 0x158   :  { %v329_v24 = vadd.f32 1e-05, %v313_v18  ;;  %v433_v22 = vmul.f32 %v2837_v14, %v422_v28 }
 0x159   :  { %v410_v11 = vsub.f32 1.5, %v409_v20 }
 0x15a   :  { %v2348_v27 = vpop.eup %2347  ;;  %2349 = vrsqrt.f32 %v329_v24  ;;  %v444_v42 = vadd.f32 %v2854_v35, %v433_v22  ;;  %vm352_vm7 = vweird.f32 %v329_v24 }
 0x15b   :  { %v411_v32 = vmul.f32 %v2346_v4, %v410_v11  ;;  %v337_v54 = vmul.f32 %v2348_v27, %v328_v6  ;;  %vm343_vm3 = vweird.f32 %v2348_v27 }
 0x15c   :  { %vm344_vm5 = vmor %vm342_vm4, %vm343_vm3 }
 0x15d   :  { %v415_v30 = vsel %vm414_vm2, %v2346_v4, %v411_v32  ;;  %v338_v25 = vmul.f32 %v2348_v27, %v337_v54 }
 0x15e   :  { %v423_v33 = vmul.f32 %v415_v30, %v327_v29 }
 0x15f   :  { %v339_v21 = vmul.f32 0.5, %v338_v25 }
 0x160   :  { %v2350_v36 = vpop.eup %2349  ;;  %v434_v39 = vmul.f32 %v2837_v14, %v423_v33 }
 0x161   :  { %v340_v12 = vsub.f32 1.5, %v339_v21  ;;  %v347_v41 = vmul.f32 %v2350_v36, %v329_v24  ;;  %vm353_vm6 = vweird.f32 %v2350_v36 }
 0x162   :  { %v445_v26 = vadd.f32 %v2854_v35, %v434_v39  ;;  %vm354_vm8 = vmor %vm352_vm7, %vm353_vm6 }
 0x163   :  { %v341_v43 = vmul.f32 %v2348_v27, %v340_v12  ;;  %v348_v0 = vmul.f32 %v2350_v36, %v347_v41 }
 0x164   :  { %v449_v46 = vpack.c.bf16 %v445_v26, %v444_v42 }
 0x165   :  { %v345_v47 = vsel %vm344_vm5, %v2348_v27, %v341_v43  ;;  %v349_v50 = vmul.f32 0.5, %v348_v0 }
 0x166   :  { %633 = vmatmul.bf16.gmra.mxu2 %v449_v46  ;;  %v416_v56 = vmul.f32 %v345_v47, %v320_v55 }
 0x167   :  { %v350_v52 = vsub.f32 1.5, %v349_v50 }
 0x168   :  { %v427_v61 = vmul.f32 %v2837_v14, %v416_v56 }
 0x169   :  { %v351_v57 = vmul.f32 %v2350_v36, %v350_v52 }
 0x16a   :  { %v438_v53 = vadd.f32 %v2854_v35, %v427_v61 }
 0x16b   :  { %v355_v59 = vsel %vm354_vm8, %v2350_v36, %v351_v57 }
 0x16c   :  { %v417_v60 = vmul.f32 %v355_v59, %v321_v58 }
 0x16e   :  { %v428_v62 = vmul.f32 %v2837_v14, %v417_v60 }
 0x170   :  { %v439_v38 = vadd.f32 %v2854_v35, %v428_v62 }
 0x172   :  { %v446_v63 = vpack.c.bf16 %v439_v38, %v438_v53 }
 0x174   :  { %618 = vmatmul.bf16.vlgmr.msrb.gmra.mxu1 %v446_v63  ;;  %676 = vmatmul.bf16.vlgmr.msra.gmra.mxu3 %v446_v63 }
 0x176   :  { %647 = vmatmul.bf16.vlgmr.msrb.gmra.mxu2 %v446_v63 }
 0x184   :  { %681 = vmatmul.bf16.gmra.mxu3 %v2870_v1 }
 0x186   :  { %652 = vmatmul.bf16.gmra.mxu2 %v2870_v1 }
 0x194   :  { %686 = vmatmul.bf16.gmra.mxu3 %v448_v16 }
 0x196   :  { %657 = vmatmul.bf16.gmra.mxu2 %v448_v16 }
 0x1a4   :  { %691 = vmatmul.bf16.gmra.mxu3 %v449_v46 }
 0x1a6   :  { %662 = vmatmul.bf16.gmra.mxu2 %v449_v46 }
 0x1c9   :  { %v624_v2 = vpop.f32.mrf.mxu2 }
 0x1d1   :  { %v626_v3 = vpop.f32.mrf.mxu2 }
 0x1d9   :  { %v629_v4 = vpop.f32.mrf.mxu2 }
 0x1e1   :  { %v631_v14 = vpop.f32.mrf.mxu2 }
 0x1e9   :  { %v634_v5 = vpop.f32.mrf.mxu2 }
 0x1f1   :  { %v636_v6 = vpop.f32.mrf.mxu2  ;;  %v619_v7 = vpop.f32.mrf.mxu1 }
 0x1f7   :  { %v677_v35 = vpop.f32.mrf.mxu3 }
 0x1f8   :  { %v698_v8 = vpack.c.bf16 %v677_v35, %v677_v35 }
 0x1f9   :  { %v648_v10 = vpop.f32.mrf.mxu2  ;;  %v621_v9 = vpop.f32.mrf.mxu1 }
 0x1fa   :  { %v697_v45 = vpack.c.bf16 %v648_v10, %v619_v7  ;;  %v999_v13 = vsel %vm997_vm9, %v698_v8, 0 }
 0x1fb   :  { %1008 = vmatpush.bf16.msrb.mxu3 %v999_v13 }
 0x1fc   :  { %v721_v1 = vrot.slane %v697_v45, 4 }
 0x1fe   :  { %800 = vmatpush.bf16.xpose.msrb.mxu0 %v721_v1 }
 0x1ff   :  { %v679_v15 = vpop.f32.mrf.mxu3 }
 0x200   :  { %v700_v36 = vpack.c.bf16 %v679_v15, %v679_v15 }
 0x201   :  { %v650_v16 = vpop.f32.mrf.mxu2 }
 0x202   :  { %v699_v17 = vpack.c.bf16 %v650_v16, %v621_v9  ;;  %v1018_v42 = vsel %vm997_vm9, %v700_v36, 0 }
 0x204   :  { %v722_v18 = vrot.slane %v699_v17, 4 }
 0x205   :  { %801 = vmatmul.bf16.vlgmr.msrb.gmra.mxu0 %v697_v45 }
 0x206   :  { %813 = vmatpush.bf16.xpose.msra.mxu0 %v722_v18 }
 0x207   :  { %v682_v19 = vpop.f32.mrf.mxu3 }
 0x208   :  { %v702_v43 = vpack.c.bf16 %v682_v19, %v682_v19 }
 0x209   :  { %v653_v20 = vpop.f32.mrf.mxu2 }
 0x20a   :  { %v701_v23 = vpack.c.bf16 %v653_v20, %v624_v2  ;;  %v1037_v50 = vsel %vm997_vm9, %v702_v43, 0  ;;  %v2948_v2 = vld [vmem:[#allocation5] sm:$0xff] }
 0x20b   :  { %v739_v7 = vrot.slane %v2948_v2, 1  ;;  %v740_v35 = vrot.slane %v2948_v2, 2 }
 0x20c   :  { %v723_v24 = vrot.slane %v701_v23, 4 }
 0x20d   :  { %v2142_v10 = vadd.f32 -1.0, %v739_v7  ;;  %v2143_v45 = vadd.f32 -1.0, %v740_v35 }
 0x20e   :  { %826 = vmatpush.bf16.xpose.msra.mxu1 %v723_v24  ;;  %v742_v24 = vrot.slane %v2948_v2, 4 }
 0x20f   :  { %v684_v11 = vpop.f32.mrf.mxu3  ;;  %v762_v1 = vmul.f32 1e+30, %v2142_v10  ;;  %v763_v15 = vmul.f32 1e+30, %v2143_v45 }
 0x210   :  { %v704_v56 = vpack.c.bf16 %v684_v11, %v684_v11 }
 0x211   :  { %v655_v27 = vpop.f32.mrf.mxu2  ;;  %v778_v9 = vperm.slane %v762_v1, 0  ;;  %v779_v16 = vperm.slane %v763_v15, 0 }
 0x212   :  { %v703_v28 = vpack.c.bf16 %v655_v27, %v626_v3  ;;  %v1056_v61 = vsel %vm997_vm9, %v704_v56, 0  ;;  %v2141_v3 = vadd.f32 -1.0, %v2948_v2 }
 0x214   :  { %v724_v32 = vrot.slane %v703_v28, 4 }
 0x215   :  { %814 = vmatmul.bf16.vlgmr.msra.gmra.mxu0 %v699_v17  ;;  %827 = vmatmul.bf16.vlgmr.msra.gmra.mxu1 %v701_v23  ;;  %v741_v17 = vrot.slane %v2948_v2, 3 }
 0x216   :  { %839 = vmatpush.bf16.xpose.msra.mxu2 %v724_v32  ;;  %v2145_v32 = vadd.f32 -1.0, %v742_v24 }
 0x217   :  { %v687_v54 = vpop.f32.mrf.mxu3 }
 0x218   :  { %v706_v29 = vpack.c.bf16 %v687_v54, %v687_v54 }
 0x219   :  { %v658_v30 = vpop.f32.mrf.mxu2 }
 0x21a   :  { %v1075_v25 = vsel %vm997_vm9, %v706_v29, 0  ;;  %v705_v33 = vpack.c.bf16 %v658_v30, %v629_v4  ;;  %v761_v4 = vmul.f32 1e+30, %v2141_v3 }
 0x21b   :  { %1084 = vmatpush.bf16.msra.mxu3 %v1075_v25  ;;  %v765_v25 = vmul.f32 1e+30, %v2145_v32 }
 0x21c   :  { %v725_v22 = vrot.slane %v705_v33, 4 }
 0x21d   :  { %840 = vmatmul.bf16.vlgmr.msra.gmra.mxu2 %v703_v28  ;;  %v2144_v28 = vadd.f32 -1.0, %v741_v17 }
 0x21e   :  { %852 = vmatpush.bf16.xpose.msrb.mxu0 %v725_v22  ;;  %v781_v22 = vperm.slane %v765_v25, 0 }
 0x21f   :  { %v689_v39 = vpop.f32.mrf.mxu3  ;;  %v764_v54 = vmul.f32 1e+30, %v2144_v28 }
 0x220   :  { %v708_v55 = vpack.c.bf16 %v689_v39, %v689_v39 }
 0x221   :  { %v660_v21 = vpop.f32.mrf.mxu2 }
 0x222   :  { %v707_v12 = vpack.c.bf16 %v660_v21, %v631_v14  ;;  %v1094_v60 = vsel %vm997_vm9, %v708_v55, 0  ;;  %v777_v14 = vperm.slane %v761_v4, 0 }
 0x224   :  { %v726_v41 = vrot.slane %v707_v12, 4 }
 0x225   :  { %853 = vmatmul.bf16.vlgmr.msrb.gmra.mxu0 %v705_v33  ;;  %v780_v33 = vperm.slane %v764_v54, 0 }
 0x226   :  { %865 = vmatpush.bf16.xpose.msra.mxu0 %v726_v41 }
 0x227   :  { %v692_v46 = vpop.f32.mrf.mxu3 }
 0x228   :  { %v710_v57 = vpack.c.bf16 %v692_v46, %v692_v46  ;;  %v744_v46 = vrot.slane %v2948_v2, 6 }
 0x229   :  { %v663_v26 = vpop.f32.mrf.mxu2 }
 0x22a   :  { %v709_v0 = vpack.c.bf16 %v663_v26, %v634_v5  ;;  %v1113_v62 = vsel %vm997_vm9, %v710_v57, 0  ;;  %v2147_v55 = vadd.f32 -1.0, %v744_v46  ;;  %v745_v57 = vrot.slane %v2948_v2, 7 }
 0x22c   :  { %v727_v47 = vrot.slane %v709_v0, 4  ;;  %v767_v56 = vmul.f32 1e+30, %v2147_v55 }
 0x22e   :  { %1027 = vmatpush.bf16.msrb.mxu0 %v1018_v42  ;;  %878 = vmatpush.bf16.xpose.msrb.mxu1 %v727_v47  ;;  %v743_v42 = vrot.slane %v2948_v2, 5 }
 0x22f   :  { %v694_v53 = vpop.f32.mrf.mxu3 }
 0x230   :  { %v712_v38 = vpack.c.bf16 %v694_v53, %v694_v53  ;;  %v2146_v43 = vadd.f32 -1.0, %v743_v42  ;;  %v2148_v53 = vadd.f32 -1.0, %v745_v57 }
 0x231   :  { %v665_v52 = vpop.f32.mrf.mxu2 }
 0x232   :  { %v711_v58 = vpack.c.bf16 %v665_v52, %v636_v6  ;;  %v1132_v63 = vsel %vm997_vm9, %v712_v38, 0 }
 0x234   :  { %v728_v59 = vrot.slane %v711_v58, 4 }
 0x235   :  { %866 = vmatmul.bf16.vlgmr.msra.gmra.mxu0 %v707_v12  ;;  %879 = vmatmul.bf16.vlgmr.msrb.gmra.mxu1 %v709_v0 }
 0x236   :  { %1046 = vmatpush.bf16.msra.mxu1 %v1037_v50  ;;  %1103 = vmatpush.bf16.msra.mxu0 %v1094_v60  ;;  %v766_v50 = vmul.f32 1e+30, %v2146_v43 }
 0x237   :  { %891 = vmatpush.bf16.xpose.msrb.mxu2 %v728_v59 }
 0x238   :  { %v782_v52 = vperm.slane %v766_v50, 0 }
 0x23a   :  { %1122 = vmatpush.bf16.msrb.mxu1 %v1113_v62 }
 0x23e   :  { %892 = vmatmul.bf16.vlgmr.msrb.gmra.mxu2 %v711_v58 }
 0x23f   :  { %1065 = vmatpush.bf16.msra.mxu2 %v1056_v61  ;;  %v783_v61 = vperm.slane %v767_v56, 0 }
 0x243   :  { %1141 = vmatpush.bf16.msrb.mxu2 %v1132_v63  ;;  %v768_v63 = vmul.f32 1e+30, %v2148_v53 }
 0x282   :  { %v802_v5 = vpop.f32.mrf.mxu0 }
 0x283   :  { %v2951_v6 = vadd.f32 %v802_v5, %v777_v14  ;;  %v784_v5 = vperm.slane %v768_v63, 0 }
 0x285   :  { %v898_v8 = vsel %vm897_vm10, %v2951_v6, -inf }
 0x286   :  { %899 = vmax.xlane.f32.xlu1 %v898_v8 }
 0x28a   :  { %v804_v13 = vpop.f32.mrf.mxu0 }
 0x292   :  { %v815_v18 = vpop.f32.mrf.mxu0  ;;  %v828_v19 = vpop.f32.mrf.mxu1 }
 0x293   :  { %v2958_v20 = vadd.f32 %v815_v18, %v778_v9  ;;  %v829_v23 = vadd.f32 %v828_v19, %v779_v16 }
 0x295   :  { %v904_v11 = vsel %vm897_vm10, %v829_v23, -inf  ;;  %v901_v27 = vsel %vm897_vm10, %v2958_v20, -inf }
 0x296   :  { %905 = vmax.xlane.f32.xlu1 %v904_v11  ;;  %902 = vmax.xlane.f32.xlu2 %v901_v27 }
 0x29a   :  { %v817_v29 = vpop.f32.mrf.mxu0  ;;  %v830_v30 = vpop.f32.mrf.mxu1 }
 0x2a0   :  { %v841_v21 = vpop.f32.mrf.mxu2 }
 0x2a1   :  { %v842_v36 = vadd.f32 %v841_v21, %v780_v33 }
 0x2a2   :  { %v854_v39 = vpop.f32.mrf.mxu0 }
 0x2a3   :  { %v855_v12 = vadd.f32 %v854_v39, %v781_v22  ;;  %v907_v41 = vsel %vm897_vm10, %v842_v36, -inf }
 0x2a4   :  { %908 = vmax.xlane.f32.xlu0 %v907_v41 }
 0x2a5   :  { %v910_v26 = vsel %vm897_vm10, %v855_v12, -inf }
 0x2a6   :  { %911 = vmax.xlane.f32.xlu2 %v910_v26 }
 0x2a8   :  { %v843_v0 = vpop.f32.mrf.mxu2 }
 0x2aa   :  { %v856_v47 = vpop.f32.mrf.mxu0 }
 0x2b2   :  { %v867_v58 = vpop.f32.mrf.mxu0  ;;  %v880_v59 = vpop.f32.mrf.mxu1 }
 0x2b3   :  { %v868_v60 = vadd.f32 %v867_v58, %v782_v52  ;;  %v881_v38 = vadd.f32 %v880_v59, %v783_v61 }
 0x2b5   :  { %v913_v62 = vsel %vm897_vm10, %v868_v60, -inf  ;;  %v916_v14 = vsel %vm897_vm10, %v881_v38, -inf }
 0x2b6   :  { %914 = vmax.xlane.f32.xlu0 %v913_v62 }
 0x2ba   :  { %v869_v3 = vpop.f32.mrf.mxu0  ;;  %v882_v4 = vpop.f32.mrf.mxu1 }
 0x2be   :  { %917 = vmax.xlane.f32.xlu0 %v916_v14 }
 0x2c1   :  { %v893_v7 = vpop.f32.mrf.mxu2 }
 0x2c2   :  { %v894_v35 = vadd.f32 %v893_v7, %v784_v5 }
 0x2c4   :  { %v919_v8 = vsel %vm897_vm10, %v894_v35, -inf }
 0x2c5   :  { %920 = vmax.xlane.f32.xlu1 %v919_v8 }
 0x2c9   :  { %v895_v10 = vpop.f32.mrf.mxu2 }
 0x2f9   :  { %v900_v45 = vpop.xlane.xlu1 %899 }
 0x2fa   :  { %v922_v13 = vsub.f32 %v2951_v6, %v900_v45 }
 0x2fc   :  { %v930_v1 = vmul.f32 1.442695, %v922_v13 }
 0x2fe   :  { %2351 = vpow2.f32 %v930_v1 }
 0x304   :  { %v2352_v15 = vpop.eup %2351 }
 0x305   :  { %v946_v9 = vsel %vm897_vm10, %v2352_v15, 0.0 }
 0x306   :  { %947 = vadd.xlane.f32.xlu2 %v946_v9 }
 0x309   :  { %v906_v16 = vpop.xlane.xlu1 %905  ;;  %v903_v17 = vpop.xlane.xlu2 %902 }
 0x30a   :  { %v924_v18 = vsub.f32 %v829_v23, %v906_v16  ;;  %v923_v19 = vsub.f32 %v2958_v20, %v903_v17  ;;  %v2285_v16 = vld [vmem:[#allocation10 + $0x38] sm:$0xff]  ;;  %v2284_v17 = vld [vmem:[#allocation10 + $0x30] sm:$0xff] }
 0x30c   :  { %v934_v24 = vmul.f32 1.442695, %v924_v18  ;;  %v932_v11 = vmul.f32 1.442695, %v923_v19  ;;  %v2283_v19 = vld [vmem:[#allocation10 + $0x28] sm:$0xff] }
 0x30e   :  { %2353 = vpow2.f32 %v934_v24  ;;  %v2282_v24 = vld [vmem:[#allocation10 + $0x20] sm:$0xff] }
 0x30f   :  { %2355 = vpow2.f32 %v932_v11 }
 0x314   :  { %v2354_v27 = vpop.eup %2353 }
 0x315   :  { %v2356_v28 = vpop.eup %2355  ;;  %v952_v32 = vsel %vm897_vm10, %v2354_v27, 0.0 }
 0x316   :  { %953 = vadd.xlane.f32.xlu0 %v952_v32  ;;  %v949_v6 = vsel %vm897_vm10, %v2356_v28, 0.0  ;;  %v2281_v32 = vld [vmem:[#allocation10 + $0x18] sm:$0xff] }
 0x317   :  { %950 = vadd.xlane.f32.xlu1 %v949_v6  ;;  %v909_v54 = vpop.xlane.xlu0 %908 }
 0x318   :  { %v925_v29 = vsub.f32 %v842_v36, %v909_v54 }
 0x319   :  { %v912_v30 = vpop.xlane.xlu2 %911 }
 0x31a   :  { %v936_v25 = vmul.f32 1.442695, %v925_v29  ;;  %v926_v33 = vsub.f32 %v855_v12, %v912_v30 }
 0x31c   :  { %2357 = vpow2.f32 %v936_v25  ;;  %v938_v23 = vmul.f32 1.442695, %v926_v33 }
 0x31e   :  { %2359 = vpow2.f32 %v938_v23 }
 0x322   :  { %v2358_v20 = vpop.eup %2357 }
 0x323   :  { %v955_v22 = vsel %vm897_vm10, %v2358_v20, 0.0 }
 0x324   :  { %v2360_v21 = vpop.eup %2359  ;;  %956 = vadd.xlane.f32.xlu2 %v955_v22  ;;  %v2280_v22 = vld [vmem:[#allocation10 + $0x10] sm:$0xff] }
 0x325   :  { %v958_v39 = vsel %vm897_vm10, %v2360_v21, 0.0 }
 0x326   :  { %959 = vadd.xlane.f32.xlu1 %v958_v39  ;;  %v2278_v39 = vld [vmem:[#allocation10] sm:$0xff] }
 0x329   :  { %v915_v41 = vpop.xlane.xlu0 %914 }
 0x32a   :  { %v927_v42 = vsub.f32 %v868_v60, %v915_v41 }
 0x32c   :  { %v940_v26 = vmul.f32 1.442695, %v927_v42 }
 0x32e   :  { %2361 = vpow2.f32 %v940_v26 }
 0x331   :  { %v918_v43 = vpop.xlane.xlu0 %917 }
 0x332   :  { %v928_v36 = vsub.f32 %v881_v38, %v918_v43 }
 0x334   :  { %v2362_v0 = vpop.eup %2361  ;;  %v942_v46 = vmul.f32 1.442695, %v928_v36 }
 0x335   :  { %v961_v12 = vsel %vm897_vm10, %v2362_v0, 0.0 }
 0x336   :  { %2363 = vpow2.f32 %v942_v46  ;;  %962 = vadd.xlane.f32.xlu2 %v961_v12 }
 0x338   :  { %v921_v47 = vpop.xlane.xlu1 %920 }
 0x339   :  { %v929_v50 = vsub.f32 %v894_v35, %v921_v47 }
 0x33b   :  { %v944_v55 = vmul.f32 1.442695, %v929_v50 }
 0x33c   :  { %v2364_v52 = vpop.eup %2363 }
 0x33d   :  { %2365 = vpow2.f32 %v944_v55  ;;  %v964_v56 = vsel %vm897_vm10, %v2364_v52, 0.0 }
 0x33e   :  { %965 = vadd.xlane.f32.xlu1 %v964_v56 }
 0x343   :  { %v2366_v57 = vpop.eup %2365 }
 0x344   :  { %v967_v58 = vsel %vm897_vm10, %v2366_v57, 0.0 }
 0x345   :  { %968 = vadd.xlane.f32.xlu0 %v967_v58 }
 0x379   :  { %v948_v59 = vpop.xlane.xlu2 %947 }
 0x37a   :  { %2367 = vrcp.f32 %v948_v59 }
 0x380   :  { %v2368_v60 = vpop.eup %2367 }
 0x381   :  { %v978_v61 = vmul.f32 %v2368_v60, %v2352_v15 }
 0x383   :  { %v986_v62 = vpack.c.bf16 %v978_v61, %v978_v61 }
 0x385   :  { %2149 = vmatmul.msk.bf16.vlgmr.msrb.gmra.mxu3 %vm897_vm10, %v986_v62 }
 0x386   :  { %1215 = vmatpush.bf16.msrb.mxu3 %v2285_v16 }
 0x389   :  { %v954_v53 = vpop.xlane.xlu0 %953 }
 0x38a   :  { %2369 = vrcp.f32 %v954_v53  ;;  %v951_v38 = vpop.xlane.xlu1 %950  ;;  %1216 = vmatpush.bf16.msrb.mxu3 %v2284_v17 }
 0x38b   :  { %2371 = vrcp.f32 %v951_v38 }
 0x38e   :  { %1217 = vmatpush.bf16.msrb.mxu3 %v2283_v19  ;;  %v2293_v19 = vld [vmem:[#allocation11 + $0x38] sm:$0xff] }
 0x390   :  { %v2370_v63 = vpop.eup %2369 }
 0x391   :  { %v2372_v3 = vpop.eup %2371  ;;  %v980_v4 = vmul.f32 %v2370_v63, %v2354_v27 }
 0x392   :  { %v979_v14 = vmul.f32 %v2372_v3, %v2356_v28  ;;  %1218 = vmatpush.bf16.msrb.mxu3 %v2282_v24  ;;  %v2291_v24 = vld [vmem:[#allocation11 + $0x28] sm:$0xff] }
 0x393   :  { %v988_v5 = vpack.c.bf16 %v980_v4, %v980_v4 }
 0x394   :  { %v987_v7 = vpack.c.bf16 %v979_v14, %v979_v14 }
 0x395   :  { %2151 = vmatmul.msk.bf16.vlgmr.msra.gmra.mxu1 %vm897_vm10, %v988_v5 }
 0x396   :  { %2150 = vmatmul.msk.bf16.vlgmr.msrb.gmra.mxu0 %vm897_vm10, %v987_v7  ;;  %1219 = vmatpush.bf16.msrb.mxu3 %v2281_v32 }
 0x397   :  { %v957_v35 = vpop.xlane.xlu2 %956  ;;  %1524 = vmatpush.bf16.msrb.mxu0 %v2293_v19 }
 0x398   :  { %2373 = vrcp.f32 %v957_v35 }
 0x399   :  { %v960_v8 = vpop.xlane.xlu1 %959 }
 0x39a   :  { %2375 = vrcp.f32 %v960_v8  ;;  %1220 = vmatpush.bf16.msrb.mxu3 %v2280_v22 }
 0x39e   :  { %v2374_v10 = vpop.eup %2373 }
 0x39f   :  { %v981_v45 = vmul.f32 %v2374_v10, %v2358_v20 }
 0x3a0   :  { %v2376_v13 = vpop.eup %2375 }
 0x3a1   :  { %v989_v1 = vpack.c.bf16 %v981_v45, %v981_v45  ;;  %v982_v15 = vmul.f32 %v2376_v13, %v2360_v21  ;;  %v2279_v21 = vld [vmem:[#allocation10 + $0x8] sm:$0xff] }
 0x3a2   :  { %1221 = vmatpush.bf16.msrb.mxu3 %v2279_v21 }
 0x3a3   :  { %v990_v9 = vpack.c.bf16 %v982_v15, %v982_v15  ;;  %2152 = vmatmul.msk.bf16.vlgmr.msra.gmra.mxu2 %vm897_vm10, %v989_v1 }
 0x3a5   :  { %2153 = vmatmul.msk.bf16.vlgmr.msra.gmra.mxu3 %vm897_vm10, %v990_v9 }
 0x3a6   :  { %1222 = vmatpush.bf16.msrb.mxu3 %v2278_v39 }
 0x3a9   :  { %v963_v18 = vpop.xlane.xlu2 %962 }
 0x3aa   :  { %2377 = vrcp.f32 %v963_v18 }
 0x3b0   :  { %v2378_v11 = vpop.eup %2377 }
 0x3b1   :  { %v983_v27 = vmul.f32 %v2378_v11, %v2362_v0  ;;  %v966_v28 = vpop.xlane.xlu1 %965  ;;  %v2290_v11 = vld [vmem:[#allocation11 + $0x20] sm:$0xff] }
 0x3b2   :  { %2379 = vrcp.f32 %v966_v28  ;;  %v2288_v28 = vld [vmem:[#allocation11 + $0x10] sm:$0xff] }
 0x3b3   :  { %v991_v6 = vpack.c.bf16 %v983_v27, %v983_v27  ;;  %v2289_v27 = vld [vmem:[#allocation11 + $0x18] sm:$0xff] }
 0x3b5   :  { %2154 = vmatmul.msk.bf16.vlgmr.msra.gmra.mxu0 %vm897_vm10, %v991_v6 }
 0x3b8   :  { %v969_v54 = vpop.xlane.xlu0 %968  ;;  %v2380_v29 = vpop.eup %2379 }
 0x3b9   :  { %2381 = vrcp.f32 %v969_v54  ;;  %v984_v30 = vmul.f32 %v2380_v29, %v2364_v52  ;;  %v2287_v54 = vld [vmem:[#allocation11 + $0x8] sm:$0xff] }
 0x3bb   :  { %v992_v25 = vpack.c.bf16 %v984_v30, %v984_v30 }
 0x3bd   :  { %2155 = vmatmul.msk.bf16.vlgmr.msrb.gmra.mxu1 %vm897_vm10, %v992_v25 }
 0x3bf   :  { %v2382_v33 = vpop.eup %2381 }
 0x3c0   :  { %v985_v23 = vmul.f32 %v2382_v33, %v2366_v57  ;;  %v2286_v33 = vld [vmem:[#allocation11] sm:$0xff] }
 0x3c2   :  { %v993_v20 = vpack.c.bf16 %v985_v23, %v985_v23 }
 0x3c4   :  { %2156 = vmatmul.msk.bf16.vlgmr.msrb.gmra.mxu2 %vm897_vm10, %v993_v20 }
 0x408   :  { %v1010_v41 = vpop.f32.mrf.mxu3 }
 0x410   :  { %v1012_v42 = vpop.f32.mrf.mxu3 }
 0x412   :  { %v1048_v26 = vpop.f32.mrf.mxu1 }
 0x413   :  { %v1029_v43 = vpop.f32.mrf.mxu0 }
 0x414   :  { %v1147_v36 = vpack.c.bf16 %v1029_v43, %v1010_v41 }
 0x416   :  { %1223 = vmatmul.bf16.vlgmr.msrb.gmra.mxu3 %v1147_v36 }
 0x41a   :  { %v1050_v0 = vpop.f32.mrf.mxu1 }
 0x41b   :  { %v1031_v46 = vpop.f32.mrf.mxu0 }
 0x426   :  { %v1067_v12 = vpop.f32.mrf.mxu2 }
 0x427   :  { %v1148_v47 = vpack.c.bf16 %v1067_v12, %v1048_v26 }
 0x428   :  { %v1086_v50 = vpop.f32.mrf.mxu3 }
 0x429   :  { %1228 = vmatmul.bf16.gmra.mxu3 %v1148_v47 }
 0x42e   :  { %v1069_v55 = vpop.f32.mrf.mxu2 }
 0x430   :  { %v1088_v52 = vpop.f32.mrf.mxu3 }
 0x432   :  { %v1105_v56 = vpop.f32.mrf.mxu0 }
 0x433   :  { %v1149_v57 = vpack.c.bf16 %v1105_v56, %v1086_v50 }
 0x439   :  { %1233 = vmatmul.bf16.gmra.mxu3 %v1149_v57 }
 0x43a   :  { %v1107_v58 = vpop.f32.mrf.mxu0  ;;  %v1124_v59 = vpop.f32.mrf.mxu1 }
 0x442   :  { %v1126_v60 = vpop.f32.mrf.mxu1 }
 0x447   :  { %v1143_v61 = vpop.f32.mrf.mxu2 }
 0x448   :  { %v1150_v62 = vpack.c.bf16 %v1143_v61, %v1124_v59 }
 0x44a   :  { %1238 = vmatmul.bf16.gmra.mxu3 %v1150_v62 }
 0x44f   :  { %v1145_v53 = vpop.f32.mrf.mxu2 }
 0x499   :  { %v1224_v38 = vpop.f32.mrf.mxu3 }
 0x49a   :  { %v2991_v63 = vadd.f32 %v1224_v38, %v2795_v51 }
 0x49c   :  { %1254 = vadd.xlane.f32.xlu2 %v2991_v63  ;;  %v1270_v3 = vmul.f32 %v2991_v63, %v2991_v63 }
 0x49e   :  { %1278 = vadd.xlane.f32.xlu1 %v1270_v3 }
 0x4a1   :  { %v1226_v4 = vpop.f32.mrf.mxu3 }
 0x4a2   :  { %v2997_v14 = vadd.f32 %v1226_v4, %v2790_v49 }
 0x4a4   :  { %1256 = vadd.xlane.f32.xlu0 %v2997_v14  ;;  %v1271_v5 = vmul.f32 %v2997_v14, %v2997_v14 }
 0x4a6   :  { %1280 = vadd.xlane.f32.xlu2 %v1271_v5 }
 0x4ac   :  { %v1229_v7 = vpop.f32.mrf.mxu3 }
 0x4ad   :  { %v3003_v51 = vadd.f32 %v1229_v7, %v2763_v31 }
 0x4af   :  { %1258 = vadd.xlane.f32.xlu0 %v3003_v51  ;;  %v1272_v35 = vmul.f32 %v3003_v51, %v3003_v51 }
 0x4b1   :  { %1282 = vadd.xlane.f32.xlu2 %v1272_v35 }
 0x4b4   :  { %v1231_v8 = vpop.f32.mrf.mxu3 }
 0x4b5   :  { %v3009_v49 = vadd.f32 %v1231_v8, %v2768_v34 }
 0x4b7   :  { %1260 = vadd.xlane.f32.xlu1 %v3009_v49  ;;  %v1273_v10 = vmul.f32 %v3009_v49, %v3009_v49 }
 0x4b9   :  { %1284 = vadd.xlane.f32.xlu0 %v1273_v10 }
 0x4bc   :  { %v1234_v45 = vpop.f32.mrf.mxu3 }
 0x4bd   :  { %v3015_v31 = vadd.f32 %v1234_v45, %v2773_v37 }
 0x4bf   :  { %1262 = vadd.xlane.f32.xlu1 %v3015_v31  ;;  %v1274_v13 = vmul.f32 %v3015_v31, %v3015_v31 }
 0x4c1   :  { %1286 = vadd.xlane.f32.xlu0 %v1274_v13  ;;  %v3050_v13 = vld [vmem:[%s3379_s8] ss:$0 sm:$0xff] }
 0x4c4   :  { %v1236_v1 = vpop.f32.mrf.mxu3 }
 0x4c5   :  { %v3021_v34 = vadd.f32 %v1236_v1, %v2778_v40 }
 0x4c7   :  { %1264 = vadd.xlane.f32.xlu2 %v3021_v34  ;;  %v1275_v15 = vmul.f32 %v3021_v34, %v3021_v34 }
 0x4c9   :  { %1288 = vadd.xlane.f32.xlu1 %v1275_v15 }
 0x4cd   :  { %v1239_v9 = vpop.f32.mrf.mxu3 }
 0x4ce   :  { %v3027_v37 = vadd.f32 %v1239_v9, %v2783_v44  ;;  %v2292_v44 = vld [vmem:[#allocation11 + $0x30] sm:$0xff] }
 0x4cf   :  { %1525 = vmatpush.bf16.msrb.mxu0 %v2292_v44 }
 0x4d0   :  { %1266 = vadd.xlane.f32.xlu2 %v3027_v37  ;;  %v1276_v16 = vmul.f32 %v3027_v37, %v3027_v37 }
 0x4d2   :  { %1290 = vadd.xlane.f32.xlu1 %v1276_v16 }
 0x4d3   :  { %1526 = vmatpush.bf16.msrb.mxu0 %v2291_v24 }
 0x4d5   :  { %v1241_v17 = vpop.f32.mrf.mxu3 }
 0x4d6   :  { %v3033_v40 = vadd.f32 %v1241_v17, %v2788_v48 }
 0x4d7   :  { %1527 = vmatpush.bf16.msrb.mxu0 %v2290_v11 }
 0x4d8   :  { %1268 = vadd.xlane.f32.xlu0 %v3033_v40  ;;  %v1277_v18 = vmul.f32 %v3033_v40, %v3033_v40 }
 0x4da   :  { %1292 = vadd.xlane.f32.xlu2 %v1277_v18 }
 0x4db   :  { %1528 = vmatpush.bf16.msrb.mxu0 %v2289_v27  ;;  %v3057_v27 = vld [vmem:[%s3380_s9] ss:$0 sm:$0xff] }
 0x4df   :  { %1529 = vmatpush.bf16.msrb.mxu0 %v2288_v28 }
 0x4e3   :  { %1530 = vmatpush.bf16.msrb.mxu0 %v2287_v54 }
 0x4e7   :  { %1531 = vmatpush.bf16.msrb.mxu0 %v2286_v33 }
 0x50f   :  { %v1255_v32 = vpop.xlane.xlu2 %1254 }
 0x510   :  { %v1294_v48 = vmul.f32 0.03125, %v1255_v32 }
 0x511   :  { %v1279_v6 = vpop.xlane.xlu1 %1278 }
 0x512   :  { %v1310_v29 = vmul.f32 %v1294_v48, %v1294_v48  ;;  %v1302_v30 = vmul.f32 0.03125, %v1279_v6  ;;  %v1326_v5 = vsub.f32 %v2991_v63, %v1294_v48 }
 0x514   :  { %v1318_v25 = vsub.f32 %v1302_v30, %v1310_v29 }
 0x516   :  { %v1334_v23 = vadd.f32 1e-05, %v1318_v25 }
 0x517   :  { %v1257_v20 = vpop.xlane.xlu0 %1256 }
 0x518   :  { %2383 = vrsqrt.f32 %v1334_v23  ;;  %v1295_v22 = vmul.f32 0.03125, %v1257_v20  ;;  %vm1348_vm12 = vweird.f32 %v1334_v23 }
 0x519   :  { %v1281_v21 = vpop.xlane.xlu2 %1280 }
 0x51a   :  { %v1311_v39 = vmul.f32 %v1295_v22, %v1295_v22  ;;  %v1303_v41 = vmul.f32 0.03125, %v1281_v21  ;;  %v1327_v9 = vsub.f32 %v2997_v14, %v1295_v22 }
 0x51c   :  { %v1319_v42 = vsub.f32 %v1303_v41, %v1311_v39 }
 0x51e   :  { %v2384_v26 = vpop.eup %2383  ;;  %v1335_v43 = vadd.f32 1e-05, %v1319_v42 }
 0x51f   :  { %v1343_v36 = vmul.f32 %v2384_v26, %v1334_v23  ;;  %vm1349_vm11 = vweird.f32 %v2384_v26 }
 0x520   :  { %2385 = vrsqrt.f32 %v1335_v43  ;;  %vm1350_vm13 = vmor %vm1348_vm12, %vm1349_vm11  ;;  %vm1358_vm15 = vweird.f32 %v1335_v43 }
 0x521   :  { %v1344_v0 = vmul.f32 %v2384_v26, %v1343_v36 }
 0x522   :  { %v1259_v46 = vpop.xlane.xlu0 %1258 }
 0x523   :  { %v1345_v12 = vmul.f32 0.5, %v1344_v0  ;;  %v3038_v47 = vmul.f32 0.03125, %v1259_v46 }
 0x524   :  { %v1283_v50 = vpop.xlane.xlu2 %1282 }
 0x525   :  { %v1346_v55 = vsub.f32 1.5, %v1345_v12  ;;  %v1312_v52 = vmul.f32 %v3038_v47, %v3038_v47  ;;  %v1304_v56 = vmul.f32 0.03125, %v1283_v50 }
 0x526   :  { %v2386_v57 = vpop.eup %2385 }
 0x527   :  { %v1347_v58 = vmul.f32 %v2384_v26, %v1346_v55  ;;  %v1353_v59 = vmul.f32 %v2386_v57, %v1335_v43  ;;  %v1320_v60 = vsub.f32 %v1304_v56, %v1312_v52  ;;  %vm1359_vm14 = vweird.f32 %v2386_v57 }
 0x528   :  { %vm1360_vm0 = vmor %vm1358_vm15, %vm1359_vm14  ;;  %v1328_v52 = vsub.f32 %v3003_v51, %v3038_v47 }
 0x529   :  { %v1354_v61 = vmul.f32 %v2386_v57, %v1353_v59  ;;  %v1336_v62 = vadd.f32 1e-05, %v1320_v60  ;;  %v1351_v38 = vsel %vm1350_vm13, %v2384_v26, %v1347_v58 }
 0x52a   :  { %v1261_v53 = vpop.xlane.xlu1 %1260  ;;  %v1422_v45 = vmul.f32 %v1351_v38, %v1326_v5 }
 0x52b   :  { %v1355_v3 = vmul.f32 0.5, %v1354_v61  ;;  %2387 = vrsqrt.f32 %v1336_v62  ;;  %v3042_v4 = vmul.f32 0.03125, %v1261_v53  ;;  %vm1368_vm2 = vweird.f32 %v1336_v62 }
 0x52c   :  { %v1285_v7 = vpop.xlane.xlu0 %1284  ;;  %v1433_v11 = vmul.f32 %v3050_v13, %v1422_v45 }
 0x52d   :  { %v1356_v35 = vsub.f32 1.5, %v1355_v3  ;;  %v1313_v8 = vmul.f32 %v3042_v4, %v3042_v4  ;;  %v1305_v10 = vmul.f32 0.03125, %v1285_v7  ;;  %v1329_v38 = vsub.f32 %v3009_v49, %v3042_v4 }
 0x52e   :  { %v1444_v25 = vadd.f32 %v3057_v27, %v1433_v11 }
 0x52f   :  { %v1357_v1 = vmul.f32 %v2386_v57, %v1356_v35  ;;  %v1321_v15 = vsub.f32 %v1305_v10, %v1313_v8 }
 0x531   :  { %v2388_v16 = vpop.eup %2387  ;;  %v1361_v17 = vsel %vm1360_vm0, %v2386_v57, %v1357_v1  ;;  %v1337_v18 = vadd.f32 1e-05, %v1321_v15 }
 0x532   :  { %v1423_v19 = vmul.f32 %v1361_v17, %v1327_v9  ;;  %v1363_v44 = vmul.f32 %v2388_v16, %v1336_v62  ;;  %v1263_v24 = vpop.xlane.xlu1 %1262  ;;  %vm1369_vm1 = vweird.f32 %v2388_v16 }
 0x533   :  { %2389 = vrsqrt.f32 %v1337_v18  ;;  %v3059_v28 = vmul.f32 0.03125, %v1263_v24  ;;  %vm1370_vm3 = vmor %vm1368_vm2, %vm1369_vm1  ;;  %vm1378_vm5 = vweird.f32 %v1337_v18 }
 0x534   :  { %v1364_v32 = vmul.f32 %v2388_v16, %v1363_v44  ;;  %v1287_v48 = vpop.xlane.xlu0 %1286  ;;  %v1434_v6 = vmul.f32 %v3050_v13, %v1423_v19 }
 0x535   :  { %v1314_v54 = vmul.f32 %v3059_v28, %v3059_v28  ;;  %v1306_v29 = vmul.f32 0.03125, %v1287_v48 }
 0x536   :  { %v1365_v30 = vmul.f32 0.5, %v1364_v32  ;;  %v1445_v33 = vadd.f32 %v3057_v27, %v1434_v6 }
 0x537   :  { %v1322_v23 = vsub.f32 %v1306_v29, %v1314_v54 }
 0x538   :  { %v1366_v20 = vsub.f32 1.5, %v1365_v30  ;;  %v1452_v22 = vpack.c.bf16 %v1445_v33, %v1444_v25 }
 0x539   :  { %v2390_v21 = vpop.eup %2389  ;;  %v1338_v39 = vadd.f32 1e-05, %v1322_v23  ;;  %v1330_v23 = vsub.f32 %v3015_v31, %v3059_v28 }
 0x53a   :  { %v1367_v41 = vmul.f32 %v2388_v16, %v1366_v20  ;;  %v1373_v42 = vmul.f32 %v2390_v21, %v1337_v18  ;;  %1532 = vmatmul.bf16.vlgmr.msrb.gmra.mxu0 %v1452_v22  ;;  %v1265_v26 = vpop.xlane.xlu2 %1264  ;;  %vm1379_vm4 = vweird.f32 %v2390_v21 }
 0x53b   :  { %2391 = vrsqrt.f32 %v1338_v39  ;;  %v3066_v43 = vmul.f32 0.03125, %v1265_v26  ;;  %vm1380_vm6 = vmor %vm1378_vm5, %vm1379_vm4  ;;  %vm1388_vm8 = vweird.f32 %v1338_v39 }
 0x53c   :  { %v1374_v36 = vmul.f32 %v2390_v21, %v1373_v42  ;;  %v1289_v0 = vpop.xlane.xlu1 %1288  ;;  %v1371_v55 = vsel %vm1370_vm3, %v2388_v16, %v1367_v41 }
 0x53d   :  { %v1315_v46 = vmul.f32 %v3066_v43, %v3066_v43  ;;  %v1307_v12 = vmul.f32 0.03125, %v1289_v0  ;;  %v1424_v60 = vmul.f32 %v1371_v55, %v1328_v52 }
 0x53e   :  { %v1375_v50 = vmul.f32 0.5, %v1374_v36  ;;  %v1331_v36 = vsub.f32 %v3021_v34, %v3066_v43 }
 0x53f   :  { %v1323_v56 = vsub.f32 %v1307_v12, %v1315_v46  ;;  %v1435_v45 = vmul.f32 %v3050_v13, %v1424_v60 }
 0x540   :  { %v1376_v57 = vsub.f32 1.5, %v1375_v50 }
 0x541   :  { %v2392_v58 = vpop.eup %2391  ;;  %v1339_v59 = vadd.f32 1e-05, %v1323_v56  ;;  %v1446_v18 = vadd.f32 %v3057_v27, %v1435_v45 }
 0x542   :  { %v1377_v61 = vmul.f32 %v2390_v21, %v1376_v57  ;;  %v1383_v62 = vmul.f32 %v2392_v58, %v1338_v39  ;;  %vm1389_vm7 = vweird.f32 %v2392_v58 }
 0x543   :  { %v1267_v53 = vpop.xlane.xlu2 %1266  ;;  %2393 = vrsqrt.f32 %v1339_v59  ;;  %vm1390_vm9 = vmor %vm1388_vm8, %vm1389_vm7  ;;  %vm1398_vm12 = vweird.f32 %v1339_v59 }
 0x544   :  { %v3074_v3 = vmul.f32 0.03125, %v1267_v53  ;;  %v1384_v5 = vmul.f32 %v2392_v58, %v1383_v62  ;;  %v1381_v47 = vsel %vm1380_vm6, %v2390_v21, %v1377_v61 }
 0x545   :  { %v1291_v7 = vpop.xlane.xlu1 %1290  ;;  %v1425_v10 = vmul.f32 %v1381_v47, %v1329_v38 }
 0x546   :  { %v1316_v35 = vmul.f32 %v3074_v3, %v3074_v3  ;;  %v1308_v8 = vmul.f32 0.03125, %v1291_v7  ;;  %v1385_v1 = vmul.f32 0.5, %v1384_v5  ;;  %v1332_v38 = vsub.f32 %v3027_v37, %v3074_v3  ;;  %v2301_v3 = vld [vmem:[#allocation13 + $0x38] sm:$0xff] }
 0x547   :  { %v1436_v9 = vmul.f32 %v3050_v13, %v1425_v10  ;;  %1697 = vmatpush.bf16.msra.mxu1 %v2301_v3 }
 0x548   :  { %v1324_v15 = vsub.f32 %v1308_v8, %v1316_v35  ;;  %v1386_v16 = vsub.f32 1.5, %v1385_v1 }
 0x549   :  { %v2394_v4 = vpop.eup %2393  ;;  %v1447_v19 = vadd.f32 %v3057_v27, %v1436_v9 }
 0x54a   :  { %v1340_v17 = vadd.f32 1e-05, %v1324_v15  ;;  %v1387_v44 = vmul.f32 %v2392_v58, %v1386_v16  ;;  %v1393_v24 = vmul.f32 %v2394_v4, %v1339_v59  ;;  %vm1399_vm11 = vweird.f32 %v2394_v4 }
 0x54b   :  { %v1269_v11 = vpop.xlane.xlu0 %1268  ;;  %v1453_v48 = vpack.c.bf16 %v1447_v19, %v1446_v18  ;;  %vm1400_vm13 = vmor %vm1398_vm12, %vm1399_vm11  ;;  %v2298_v18 = vld [vmem:[#allocation13 + $0x20] sm:$0xff]  ;;  %v2297_v19 = vld [vmem:[#allocation13 + $0x18] sm:$0xff] }
 0x54c   :  { %2395 = vrsqrt.f32 %v1340_v17  ;;  %v1301_v32 = vmul.f32 0.03125, %v1269_v11  ;;  %v1394_v6 = vmul.f32 %v2394_v4, %v1393_v24  ;;  %v1391_v33 = vsel %vm1390_vm9, %v2392_v58, %v1387_v44  ;;  %v2296_v44 = vld [vmem:[#allocation13 + $0x10] sm:$0xff]  ;;  %v2295_v24 = vld [vmem:[#allocation13 + $0x8] sm:$0xff] }
 0x54d   :  { %v1293_v54 = vpop.xlane.xlu2 %1292  ;;  %1537 = vmatmul.bf16.gmra.mxu0 %v1453_v48  ;;  %v1426_v42 = vmul.f32 %v1391_v33, %v1330_v23  ;;  %vm1408_vm15 = vweird.f32 %v1340_v17 }
 0x54e   :  { %v1317_v29 = vmul.f32 %v1301_v32, %v1301_v32  ;;  %v1309_v30 = vmul.f32 0.03125, %v1293_v54  ;;  %v1395_v25 = vmul.f32 0.5, %v1394_v6  ;;  %v1333_v35 = vsub.f32 %v3033_v40, %v1301_v32 }
 0x54f   :  { %v1437_v50 = vmul.f32 %v3050_v13, %v1426_v42 }
 0x550   :  { %v1325_v20 = vsub.f32 %v1309_v30, %v1317_v29  ;;  %v1396_v22 = vsub.f32 1.5, %v1395_v25  ;;  %v1735_v29 = vlaneseq }
 0x551   :  { %v1448_v57 = vadd.f32 %v3057_v27, %v1437_v50 }
 0x552   :  { %v2396_v21 = vpop.eup %2395  ;;  %v1341_v41 = vadd.f32 1e-05, %v1325_v20  ;;  %v1397_v26 = vmul.f32 %v2394_v4, %v1396_v22  ;;  %v1736_v23 = vshrl.u32 %v1735_v29, 7 }
 0x553   :  { %v1403_v39 = vmul.f32 %v2396_v21, %v1340_v17  ;;  %vm1409_vm14 = vweird.f32 %v2396_v21  ;;  %v2299_v17 = vld [vmem:[#allocation13 + $0x28] sm:$0xff] }
 0x554   :  { %2397 = vrsqrt.f32 %v1341_v41  ;;  %v1401_v46 = vsel %vm1400_vm13, %v2394_v4, %v1397_v26  ;;  %vm1410_vm0 = vmor %vm1408_vm15, %vm1409_vm14  ;;  %vm1418_vm2 = vweird.f32 %v1341_v41  ;;  %v2300_v4 = vld [vmem:[#allocation13 + $0x30] sm:$0xff]  ;;  %2325 = vset.pattern.permute.xlu1 %v1736_v23  ;;  %2327 = vset.pattern.permute.xlu0 %v1736_v23 }
 0x555   :  { %v1404_v0 = vmul.f32 %v2396_v21, %v1403_v39  ;;  %v1427_v12 = vmul.f32 %v1401_v46, %v1331_v36  ;;  %1698 = vmatpush.bf16.msra.mxu1 %v2300_v4  ;;  %2326 = vset.pattern.permute.xlu2 %v1736_v23  ;;  %v1734_v39 = vperm.slane %v2948_v2, 0 }
 0x557   :  { %v1405_v28 = vmul.f32 0.5, %v1404_v0  ;;  %v1438_v55 = vmul.f32 %v3050_v13, %v1427_v12 }
 0x559   :  { %v1406_v52 = vsub.f32 1.5, %v1405_v28  ;;  %v1449_v58 = vadd.f32 %v3057_v27, %v1438_v55  ;;  %1699 = vmatpush.bf16.msra.mxu1 %v2299_v17 }
 0x55a   :  { %v2398_v56 = vpop.eup %2397 }
 0x55b   :  { %v1407_v59 = vmul.f32 %v2396_v21, %v1406_v52  ;;  %v1413_v60 = vmul.f32 %v2398_v56, %v1341_v41  ;;  %v1454_v43 = vpack.c.bf16 %v1449_v58, %v1448_v57  ;;  %vm1419_vm1 = vweird.f32 %v2398_v56 }
 0x55c   :  { %vm1420_vm3 = vmor %vm1418_vm2, %vm1419_vm1  ;;  %1739 = vperm.xlu1 %2325, %v1734_v39  }
 0x55d   :  { %v1414_v61 = vmul.f32 %v2398_v56, %v1413_v60  ;;  %1542 = vmatmul.bf16.gmra.mxu0 %v1454_v43  ;;  %v1411_v53 = vsel %vm1410_vm0, %v2396_v21, %v1407_v59  ;;  %1700 = vmatpush.bf16.msra.mxu1 %v2298_v18  ;;  %v1798_v21 = vsel %vm897_vm10, %v2948_v2, 0.0 }
 0x55e   :  { %v1428_v7 = vmul.f32 %v1411_v53, %v1332_v38  ;;  %1799 = vadd.xlane.f32.xlu0 %v1798_v21 }
 0x55f   :  { %v1415_v62 = vmul.f32 0.5, %v1414_v61 }
 0x560   :  { %v1439_v45 = vmul.f32 %v3050_v13, %v1428_v7 }
 0x561   :  { %v1416_v5 = vsub.f32 1.5, %v1415_v62  ;;  %1701 = vmatpush.bf16.msra.mxu1 %v2297_v19 }
 0x562   :  { %v1450_v15 = vadd.f32 %v3057_v27, %v1439_v45  ;;  %v3110_v45 = vld [vmem:[#allocation5] sm:$0xff] }
 0x563   :  { %v1417_v47 = vmul.f32 %v2398_v56, %v1416_v5  ;;  %v1762_v3 = vperm.slane %v3110_v45, 4  ;;  %v1776_v39 = vperm.slane %v3110_v45, 6 }
 0x565   :  { %v1421_v8 = vsel %vm1420_vm3, %v2398_v56, %v1417_v47  ;;  %1702 = vmatpush.bf16.msra.mxu1 %v2296_v44  ;;  %1767 = vperm.xlu1 %2325, %v1762_v3  }
 0x566   :  { %v1429_v10 = vmul.f32 %v1421_v8, %v1333_v35 }
 0x568   :  { %v1440_v1 = vmul.f32 %v3050_v13, %v1429_v10  ;;  %v3100_v13 = vld [vmem:[%s3382_s11] ss:$0 sm:$0xff] }
 0x569   :  { %1703 = vmatpush.bf16.msra.mxu1 %v2295_v24 }
 0x56a   :  { %v1451_v9 = vadd.f32 %v3057_v27, %v1440_v1  ;;  %v2294_v27 = vld [vmem:[#allocation13] sm:$0xff]  ;;  %v1748_v1 = vperm.slane %v3110_v45, 2 }
 0x56c   :  { %v1455_v16 = vpack.c.bf16 %v1451_v9, %v1450_v15 }
 0x56d   :  { %1704 = vmatpush.bf16.msra.mxu1 %v2294_v27  ;;  %1781 = vperm.xlu1 %2325, %v1776_v39  }
 0x56e   :  { %1547 = vmatmul.bf16.gmra.mxu0 %v1455_v16  ;;  %v1741_v16 = vperm.slane %v3110_v45, 1 }
 0x570   :  { %1746 = vperm.xlu2 %2326, %v1741_v16  }
 0x572   :  { %1753 = vperm.xlu0 %2327, %v1748_v1  }
 0x5b7   :  { %v1533_v11 = vpop.f32.mrf.mxu0 }
 0x5b8   :  { %v1534_v32 = vadd.f32 %v3100_v13, %v1533_v11 }
 0x5ba   :  { %v1553_v48 = vmul.f32 %v1534_v32, %v1534_v32 }
 0x5bc   :  { %v1561_v6 = vmul.f32 %v1553_v48, %v1534_v32 }
 0x5be   :  { %v1569_v54 = vmul.f32 0.044715, %v1561_v6 }
 0x5bf   :  { %v1535_v30 = vpop.f32.mrf.mxu0 }
 0x5c0   :  { %v1577_v25 = vadd.f32 %v1569_v54, %v1534_v32  ;;  %v1536_v33 = vadd.f32 %v3100_v13, %v1535_v30 }
 0x5c2   :  { %v1585_v20 = vmul.f32 0.7978846, %v1577_v25  ;;  %v1554_v22 = vmul.f32 %v1536_v33, %v1536_v33 }
 0x5c4   :  { %v1562_v41 = vmul.f32 %v1554_v22, %v1536_v33  ;;  %2399 = vtanh.f32 %v1585_v20 }
 0x5c6   :  { %v1570_v42 = vmul.f32 0.044715, %v1562_v41 }
 0x5c8   :  { %v1578_v26 = vadd.f32 %v1570_v42, %v1536_v33 }
 0x5ca   :  { %v1586_v36 = vmul.f32 0.7978846, %v1578_v26  ;;  %v1538_v0 = vpop.f32.mrf.mxu0  ;;  %v2400_v12 = vpop.eup %2399 }
 0x5cb   :  { %v1539_v46 = vadd.f32 %v3100_v13, %v1538_v0  ;;  %v1601_v28 = vadd.f32 1.0, %v2400_v12 }
 0x5cc   :  { %2401 = vtanh.f32 %v1586_v36  ;;  %v1755_v36 = vperm.slane %v3110_v45, 3 }
 0x5cd   :  { %v1555_v50 = vmul.f32 %v1539_v46, %v1539_v46  ;;  %v1609_v58 = vmul.f32 0.5, %v1601_v28 }
 0x5ce   :  { %1760 = vperm.xlu2 %2326, %v1755_v36  }
 0x5cf   :  { %v1563_v55 = vmul.f32 %v1555_v50, %v1539_v46  ;;  %v1617_v53 = vmul.f32 %v1609_v58, %v1534_v32 }
 0x5d1   :  { %v1571_v52 = vmul.f32 0.044715, %v1563_v55 }
 0x5d2   :  { %v2402_v56 = vpop.eup %2401  ;;  %v1540_v57 = vpop.f32.mrf.mxu0 }
 0x5d3   :  { %v1602_v59 = vadd.f32 1.0, %v2402_v56  ;;  %v1579_v60 = vadd.f32 %v1571_v52, %v1539_v46  ;;  %v1541_v43 = vadd.f32 %v3100_v13, %v1540_v57  ;;  %v1769_v56 = vperm.slane %v3110_v45, 5 }
 0x5d5   :  { %v1610_v61 = vmul.f32 0.5, %v1602_v59  ;;  %v1556_v2 = vmul.f32 %v1541_v43, %v1541_v43  ;;  %v1587_v62 = vmul.f32 0.7978846, %v1579_v60 }
 0x5d6   :  { %1774 = vperm.xlu2 %2326, %v1769_v56  }
 0x5d7   :  { %v1618_v38 = vmul.f32 %v1610_v61, %v1536_v33  ;;  %v1564_v5 = vmul.f32 %v1556_v2, %v1541_v43  ;;  %2403 = vtanh.f32 %v1587_v62 }
 0x5d9   :  { %v1572_v7 = vmul.f32 0.044715, %v1564_v5  ;;  %v1625_v47 = vpack.c.bf16 %v1618_v38, %v1617_v53 }
 0x5da   :  { %v1543_v35 = vpop.f32.mrf.mxu0 }
 0x5db   :  { %v1580_v8 = vadd.f32 %v1572_v7, %v1541_v43  ;;  %v1544_v10 = vadd.f32 %v3100_v13, %v1543_v35  ;;  %1705 = vmatmul.bf16.vlgmr.msra.gmra.mxu1 %v1625_v47  ;;  %v1783_v47 = vperm.slane %v3110_v45, 7 }
 0x5dd   :  { %v1557_v15 = vmul.f32 %v1544_v10, %v1544_v10  ;;  %v1588_v9 = vmul.f32 0.7978846, %v1580_v8  ;;  %v2404_v4 = vpop.eup %2403 }
 0x5de   :  { %v1603_v44 = vadd.f32 1.0, %v2404_v4  ;;  %1788 = vperm.xlu2 %2326, %v1783_v47  }
 0x5df   :  { %v1565_v17 = vmul.f32 %v1557_v15, %v1544_v10  ;;  %2405 = vtanh.f32 %v1588_v9 }
 0x5e0   :  { %v1611_v54 = vmul.f32 0.5, %v1603_v44 }
 0x5e1   :  { %v1573_v18 = vmul.f32 0.044715, %v1565_v17 }
 0x5e2   :  { %v1545_v19 = vpop.f32.mrf.mxu0  ;;  %v1619_v23 = vmul.f32 %v1611_v54, %v1539_v46  ;;  %v3140_v54 = vld [vmem:[%s3384_s13] ss:$0 sm:$0xff]  ;;  %s2647_s13 = smov [#allocation14]  }
 0x5e3   :  { %v1581_v24 = vadd.f32 %v1573_v18, %v1544_v10  ;;  %v1546_v27 = vadd.f32 %v3100_v13, %v1545_v19  ;;  %v1800_v18 = vpop.xlane.xlu0 %1799  ;;  %s2022_s20 = sshll.u32 %s2647_s13, 4  ;;  %s2023_s20 = int_to_ptr.vmem [resolvable:$true] %s2022_s20 }
 0x5e4   :  { %v3122_v19 = vmax.f32 %v1800_v18, 1.0 }
 0x5e5   :  { %v2406_v11 = vpop.eup %2405  ;;  %v1558_v32 = vmul.f32 %v1546_v27, %v1546_v27  ;;  %v1589_v48 = vmul.f32 0.7978846, %v1581_v24 }
 0x5e6   :  { %v1604_v6 = vadd.f32 1.0, %v2406_v11  ;;  %v1851_v45 = vrot.slane %v3122_v19, 1  ;;  %vm1871_vm10 = vweird.f32 %v3122_v19 }
 0x5e7   :  { %v1566_v29 = vmul.f32 %v1558_v32, %v1546_v27  ;;  %2407 = vtanh.f32 %v1589_v48 }
 0x5e8   :  { %v1612_v30 = vmul.f32 0.5, %v1604_v6  ;;  %vm1886_vm5 = vweird.f32 %v1851_v45 }
 0x5e9   :  { %v1574_v25 = vmul.f32 0.044715, %v1566_v29 }
 0x5ea   :  { %v1620_v20 = vmul.f32 %v1612_v30, %v1541_v43  ;;  %v3143_v30 = vrot.slane %v3122_v19, 3 }
 0x5eb   :  { %v1548_v33 = vpop.f32.mrf.mxu0  ;;  %v1582_v22 = vadd.f32 %v1574_v25, %v1546_v27 }
 0x5ec   :  { %v1549_v21 = vadd.f32 %v3100_v13, %v1548_v33  ;;  %v1626_v41 = vpack.c.bf16 %v1620_v20, %v1619_v23  ;;  %vm1916_vm0 = vweird.f32 %v3143_v30 }
 0x5ed   :  { %v1590_v26 = vmul.f32 0.7978846, %v1582_v22  ;;  %v2408_v0 = vpop.eup %2407  ;;  %v3150_v22 = vrot.slane %v3122_v19, 4 }
 0x5ee   :  { %v1559_v42 = vmul.f32 %v1549_v21, %v1549_v21  ;;  %1710 = vmatmul.bf16.gmra.mxu1 %v1626_v41  ;;  %v1605_v46 = vadd.f32 1.0, %v2408_v0  ;;  %v1877_v41 = vand.u32 2147483648, %v3122_v19 }
 0x5ef   :  { %2409 = vtanh.f32 %v1590_v26  ;;  %v1747_v26 = vpop.permute.xlu2 %1746  ;;  %vm1931_vm2 = vweird.f32 %v3150_v22 }
 0x5f0   :  { %v1567_v12 = vmul.f32 %v1559_v42, %v1549_v21  ;;  %v1613_v43 = vmul.f32 0.5, %v1605_v46  ;;  %v1892_v46 = vand.u32 2147483648, %v1851_v45 }
 0x5f2   :  { %v1575_v50 = vmul.f32 0.044715, %v1567_v12  ;;  %v1621_v53 = vmul.f32 %v1613_v43, %v1544_v10  ;;  %v1875_v12 = vand.u32 2147483647, %v3122_v19  ;;  %v1878_v43 = vor.u32 1.1754944e-38, %v1877_v41 }
 0x5f3   :  { %v1550_v28 = vpop.f32.mrf.mxu0 }
 0x5f4   :  { %v1583_v55 = vadd.f32 %v1575_v50, %v1549_v21  ;;  %v1551_v52 = vadd.f32 %v3100_v13, %v1550_v28  ;;  %v1740_v50 = vpop.permute.xlu1 %1739  ;;  %v1890_v28 = vand.u32 2147483647, %v1851_v45  ;;  %vm3184_vm9 = vcmp.eq.f32.partialorder %v1875_v12, 8.507059e+37 }
 0x5f5   :  { %v2410_v57 = vpop.eup %2409 }
 0x5f6   :  { %v1560_v58 = vmul.f32 %v1551_v52, %v1551_v52  ;;  %v1591_v59 = vmul.f32 0.7978846, %v1583_v55  ;;  %v1606_v60 = vadd.f32 1.0, %v2410_v57  ;;  %vm3188_vm11 = vcmp.eq.f32.partialorder %v1890_v28, 8.507059e+37 }
 0x5f8   :  { %v1568_v61 = vmul.f32 %v1560_v58, %v1551_v52  ;;  %v1614_v2 = vmul.f32 0.5, %v1606_v60  ;;  %2411 = vtanh.f32 %v1591_v59 }
 0x5fa   :  { %v1576_v62 = vmul.f32 0.044715, %v1568_v61  ;;  %v1622_v38 = vmul.f32 %v1614_v2, %v1546_v27  ;;  %v3129_v27 = vrot.slane %v3122_v19, 2 }
 0x5fc   :  { %v1584_v5 = vadd.f32 %v1576_v62, %v1551_v52  ;;  %v1627_v7 = vpack.c.bf16 %v1622_v38, %v1621_v53  ;;  %vm1901_vm12 = vweird.f32 %v3129_v27  ;;  %v1907_v18 = vand.u32 2147483648, %v3129_v27 }
 0x5fe   :  { %v1592_v35 = vmul.f32 0.7978846, %v1584_v5  ;;  %1715 = vmatmul.bf16.gmra.mxu1 %v1627_v7  ;;  %v2412_v13 = vpop.eup %2411  ;;  %v1893_v5 = vor.u32 1.1754944e-38, %v1892_v46 }
 0x5ff   :  { %v1607_v8 = vadd.f32 1.0, %v2412_v13 }
 0x600   :  { %2413 = vtanh.f32 %v1592_v35 }
 0x601   :  { %v1615_v9 = vmul.f32 0.5, %v1607_v8  ;;  %2415 = vrcp.f32 %v3122_v19 }
 0x602   :  { %2417 = vrcp.f32 %v1851_v45 }
 0x603   :  { %v1623_v3 = vmul.f32 %v1615_v9, %v1549_v21  ;;  %2419 = vrcp.f32 %v3129_v27 }
 0x604   :  { %2421 = vrcp.f32 %v3143_v30 }
 0x605   :  { %2423 = vrcp.f32 %v3150_v22 }
 0x606   :  { %v2414_v1 = vpop.eup %2413 }
 0x607   :  { %v1608_v15 = vadd.f32 1.0, %v2414_v1  ;;  %v3126_v24 = vpop.eup %2415 }
 0x608   :  { %v3131_v11 = vpop.eup %2417  ;;  %v1867_v32 = vmul.f32 %v3126_v24, %v3122_v19  ;;  %vm1872_vm4 = vweird.f32 %v3126_v24 }
 0x609   :  { %v1616_v16 = vmul.f32 0.5, %v1608_v15  ;;  %v1882_v6 = vmul.f32 %v3131_v11, %v1851_v45  ;;  %v3145_v33 = vpop.eup %2419  ;;  %vm1887_vm6 = vweird.f32 %v3131_v11  ;;  %vm3164_vm7 = vmor %vm1871_vm10, %vm1872_vm4 }
 0x60a   :  { %v1868_v29 = vsub.f32 1.0, %v1867_v32  ;;  %v1897_v39 = vmul.f32 %v3145_v33, %v3129_v27  ;;  %v3172_v56 = vpop.eup %2421  ;;  %vm3176_vm8 = vmor %vm1886_vm5, %vm1887_vm6  ;;  %vm1902_vm13 = vweird.f32 %v3145_v33  ;;  %v3216_v32 = vrot.slane %v3122_v19, 7 }
 0x60b   :  { %v1624_v4 = vmul.f32 %v1616_v16, %v1551_v52  ;;  %v1883_v25 = vsub.f32 1.0, %v1882_v6  ;;  %v3192_v47 = vpop.eup %2423  ;;  %v1912_v13 = vmul.f32 %v3172_v56, %v3143_v30  ;;  %vm3231_vm14 = vmor %vm1901_vm12, %vm1902_vm13  ;;  %vm1917_vm1 = vweird.f32 %v3172_v56 }
 0x60c   :  { %v1869_v20 = vmul.f32 %v3126_v24, %v1868_v29  ;;  %v1898_v59 = vsub.f32 1.0, %v1897_v39  ;;  %vm1932_vm3 = vweird.f32 %v3192_v47  ;;  %vm3269_vm10 = vmor %vm1916_vm0, %vm1917_vm1  ;;  %vm1976_vm0 = vweird.f32 %v3216_v32 }
 0x60d   :  { %v1628_v17 = vpack.c.bf16 %v1624_v4, %v1623_v3  ;;  %v1884_v42 = vmul.f32 %v3131_v11, %v1883_v25  ;;  %v3205_v3 = vrot.slane %v3122_v19, 6  ;;  %v1905_v4 = vand.u32 2147483647, %v3129_v27  ;;  %vm3281_vm5 = vmor %vm1931_vm2, %vm1932_vm3 }
 0x60e   :  { %v1870_v0 = vadd.f32 %v3126_v24, %v1869_v20  ;;  %v1899_v15 = vmul.f32 %v3145_v33, %v1898_v59  ;;  %vm1995_vm2 = vcmask 1041409   ;;  %vm1998_vm3 = vcmask 1042434  }
 0x60f   :  { %1720 = vmatmul.bf16.gmra.mxu1 %v1628_v17  ;;  %v1885_v57 = vadd.f32 %v3131_v11, %v1884_v42  ;;  %v1754_v17 = vpop.permute.xlu0 %1753  ;;  %vm3235_vm15 = vcmp.eq.f32.partialorder %v1905_v4, 8.507059e+37 }
 0x610   :  { %v1874_v62 = vsel %vm3164_vm7, %v3126_v24, %v1870_v0  ;;  %v1913_v24 = vsub.f32 1.0, %v1912_v13  ;;  %v1937_v13 = vand.u32 2147483648, %v3150_v22 }
 0x611   :  { %v1889_v1 = vsel %vm3176_vm8, %v3131_v11, %v1885_v57  ;;  %v1768_v11 = vpop.permute.xlu1 %1767  ;;  %v1922_v57 = vand.u32 2147483648, %v3143_v30 }
 0x628   :  { %v1761_v16 = vpop.permute.xlu2 %1760 }
 0x658   :  { %v1706_v10 = vpop.f32.mrf.mxu1 }
 0x659   :  { %v1707_v23 = vadd.f32 %v3140_v54, %v1706_v10 }
 0x65b   :  { %v1726_v36 = vadd.f32 %v1707_v23, %v2991_v63  ;;  %v3170_v63 = vrot.slane %v3122_v19, 5 }
 0x65d   :  { %v1790_v60 = vmul.f32 %v1740_v50, %v1726_v36  ;;  %2425 = vrcp.f32 %v3170_v63  ;;  %v1914_v36 = vmul.f32 %v3172_v56, %v1913_v24  ;;  %vm1946_vm6 = vweird.f32 %v3170_v63 }
 0x65e   :  { %2427 = vrcp.f32 %v3205_v3 }
 0x65f   :  { %2429 = vrcp.f32 %v3216_v32  ;;  %v1915_v61 = vadd.f32 %v3172_v56, %v1914_v36 }
 0x660   :  { %v1708_v44 = vpop.f32.mrf.mxu1 }
 0x661   :  { %v1709_v52 = vadd.f32 %v3140_v54, %v1708_v44 }
 0x663   :  { %v1727_v35 = vadd.f32 %v1709_v52, %v2997_v14  ;;  %v1801_v14 = vrot.slane %v1790_v60, 4  ;;  %v3223_v29 = vpop.eup %2425  ;;  %v1920_v52 = vand.u32 2147483647, %v3143_v30 }
 0x664   :  { %v1942_v50 = vmul.f32 %v3223_v29, %v3170_v63  ;;  %vm1947_vm7 = vweird.f32 %v3223_v29 }
 0x665   :  { %v1791_v44 = vmul.f32 %v1747_v26, %v1727_v35  ;;  %v1802_v25 = vadd.f32 %v1801_v14, %v1790_v60  ;;  %vm3274_vm4 = vcmp.eq.f32.partialorder %v1920_v52, 8.507059e+37 }
 0x667   :  { %v1807_v39 = vrot.slane %v1791_v44, 4  ;;  %v1803_v28 = vrot.slane %v1802_v25, 2 }
 0x669   :  { %v1808_v60 = vadd.f32 %v1807_v39, %v1791_v44 }
 0x66b   :  { %v1711_v48 = vpop.f32.mrf.mxu1  ;;  %v1809_v4 = vrot.slane %v1808_v60, 2 }
 0x66c   :  { %v1712_v58 = vadd.f32 %v3140_v54, %v1711_v48  ;;  %v3220_v48 = vsel %vm3184_vm9, %v1878_v43, %v1874_v62  ;;  %v3259_v62 = vpop.eup %2427  ;;  %vm3306_vm9 = vmor %vm1946_vm6, %vm1947_vm7  ;;  %vm2004_vm6 = vcmask 1044484   ;;  %vm2007_vm7 = vcmask 1045509  }
 0x66d   :  { %v3263_v38 = vpop.eup %2429  ;;  %v1957_v24 = vmul.f32 %v3259_v62, %v3205_v3  ;;  %v1810_v19 = vadd.f32 %v1809_v4, %v1808_v60  ;;  %vm1962_vm12 = vweird.f32 %v3259_v62 }
 0x66e   :  { %v1728_v9 = vadd.f32 %v1712_v58, %v3003_v51  ;;  %v1927_v51 = vmul.f32 %v3192_v47, %v3150_v22  ;;  %vm1977_vm1 = vweird.f32 %v3263_v38 }
 0x66f   :  { %v1811_v52 = vrot.slane %v1810_v19, 1 }
 0x670   :  { %v1792_v6 = vmul.f32 %v1754_v17, %v1728_v9  ;;  %v1928_v42 = vsub.f32 1.0, %v1927_v51  ;;  %v1935_v17 = vand.u32 2147483647, %v3150_v22  ;;  %v1919_v51 = vsel %vm3269_vm10, %v3172_v56, %v1915_v61  ;;  %v1782_v56 = vpop.permute.xlu1 %1781  ;;  %vm3355_vm10 = vmor %vm1976_vm0, %vm1977_vm1 }
 0x672   :  { %v1813_v12 = vrot.slane %v1792_v6, 4  ;;  %v1929_v59 = vmul.f32 %v3192_v47, %v1928_v42  ;;  %vm1936_vm8 = vcmp.eq.f32.partialorder %v1935_v17, 8.507059e+37 }
 0x673   :  { %v1713_v21 = vpop.f32.mrf.mxu1 }
 0x674   :  { %v1714_v2 = vadd.f32 %v3140_v54, %v1713_v21  ;;  %v1908_v21 = vor.u32 1.1754944e-38, %v1907_v18  ;;  %v1814_v53 = vadd.f32 %v1813_v12, %v1792_v6  ;;  %v1938_v6 = vor.u32 1.1754944e-38, %v1937_v13 }
 0x675   :  { %v1812_v13 = vadd.f32 %v1811_v52, %v1810_v19 }
 0x676   :  { %v1729_v10 = vadd.f32 %v1714_v2, %v3009_v49  ;;  %v1900_v49 = vadd.f32 %v3145_v33, %v1899_v15  ;;  %v1923_v15 = vor.u32 1.1754944e-38, %v1922_v57 }
 0x678   :  { %v1793_v20 = vmul.f32 %v1761_v16, %v1729_v10  ;;  %v1904_v0 = vsel %vm3231_vm14, %v3145_v33, %v1900_v49  ;;  %v1775_v33 = vpop.permute.xlu2 %1774  ;;  %v1930_v16 = vadd.f32 %v3192_v47, %v1929_v59  ;;  %v1924_v42 = vsel %vm3274_vm4, %v1923_v15, %v1919_v51 }
 0x679   :  { %v3256_v43 = vsel %vm3235_vm15, %v1908_v21, %v1904_v0  ;;  %v1972_v0 = vmul.f32 %v3263_v38, %v3216_v32 }
 0x67a   :  { %v1819_v46 = vrot.slane %v1793_v20, 4  ;;  %v1934_v22 = vsel %vm3281_vm5, %v3192_v47, %v1930_v16  ;;  %vm2001_vm5 = vcmask 1043459  }
 0x67b   :  { %v1716_v7 = vpop.f32.mrf.mxu1 }
 0x67c   :  { %v1717_v8 = vadd.f32 %v3140_v54, %v1716_v7  ;;  %v1820_v35 = vadd.f32 %v1819_v46, %v1793_v20  ;;  %v1952_v46 = vand.u32 2147483648, %v3170_v63  ;;  %v1967_v7 = vand.u32 2147483648, %v3205_v3 }
 0x67e   :  { %v1730_v45 = vadd.f32 %v1717_v8, %v3015_v31  ;;  %v3227_v31 = vsel %vm3188_vm11, %v1893_v5, %v1889_v1  ;;  %v1804_v5 = vadd.f32 %v1803_v28, %v1802_v25  ;;  %v1821_v49 = vrot.slane %v1820_v35, 2 }
 0x67f   :  { %v1950_v28 = vand.u32 2147483647, %v3170_v63  ;;  %vm1961_vm11 = vweird.f32 %v3205_v3  ;;  %v1953_v16 = vor.u32 1.1754944e-38, %v1952_v46  ;;  %v1968_v51 = vor.u32 1.1754944e-38, %v1967_v7 }
 0x680   :  { %v1794_v41 = vmul.f32 %v1768_v11, %v1730_v45  ;;  %v1815_v45 = vrot.slane %v1814_v53, 2  ;;  %v1805_v11 = vrot.slane %v1804_v5, 1  ;;  %v1822_v47 = vadd.f32 %v1821_v49, %v1820_v35  ;;  %v1789_v35 = vpop.permute.xlu2 %1788  ;;  %vm3332_vm14 = vmor %vm1961_vm11, %vm1962_vm12 }
 0x681   :  { %vm3325_vm13 = vcmp.eq.f32.partialorder %v1950_v28, 8.507059e+37 }
 0x682   :  { %v1825_v58 = vrot.slane %v1794_v41, 4  ;;  %v3304_v39 = vadd.f32 %v1805_v11, %v1804_v5 }
 0x683   :  { %v1718_v26 = vpop.f32.mrf.mxu1 }
 0x684   :  { %v1719_v27 = vadd.f32 %v3140_v54, %v1718_v26  ;;  %v1826_v9 = vadd.f32 %v1825_v58, %v1794_v41  ;;  %v1816_v41 = vadd.f32 %v1815_v45, %v1814_v53  ;;  %v1958_v26 = vsub.f32 1.0, %v1957_v24 }
 0x686   :  { %v1731_v55 = vadd.f32 %v1719_v27, %v3021_v34  ;;  %v1943_v34 = vsub.f32 1.0, %v1942_v50  ;;  %v1827_v23 = vrot.slane %v1826_v9, 2  ;;  %v1939_v50 = vsel %vm1936_vm8, %v1938_v6, %v1934_v22 }
 0x687   :  { %v1959_v61 = vmul.f32 %v3259_v62, %v1958_v26  ;;  %vm2010_vm8 = vcmask 1046534  }
 0x688   :  { %v1795_v2 = vmul.f32 %v1775_v33, %v1731_v55  ;;  %v1944_v44 = vmul.f32 %v3223_v29, %v1943_v34  ;;  %v1828_v12 = vadd.f32 %v1827_v23, %v1826_v9  ;;  %v1817_v33 = vrot.slane %v1816_v41, 1 }
 0x689   :  { %v1973_v34 = vsub.f32 1.0, %v1972_v0 }
 0x68a   :  { %v1831_v8 = vrot.slane %v1795_v2, 4  ;;  %v1829_v5 = vrot.slane %v1828_v12, 1  ;;  %v1818_v15 = vadd.f32 %v1817_v33, %v1816_v41 }
 0x68b   :  { %v1974_v17 = vmul.f32 %v3263_v38, %v1973_v34 }
 0x68c   :  { %v1721_v14 = vpop.f32.mrf.mxu1  ;;  %v1832_v10 = vadd.f32 %v1831_v8, %v1795_v2  ;;  %v1823_v2 = vrot.slane %v1822_v47, 1  ;;  %v1910_v11 = vmul.f32 %v3256_v43, %v1818_v15 }
 0x68d   :  { %v1722_v18 = vadd.f32 %v3140_v54, %v1721_v14  ;;  %v1975_v22 = vadd.f32 %v3263_v38, %v1974_v17 }
 0x68e   :  { %v1833_v20 = vrot.slane %v1832_v10, 2  ;;  %v1824_v14 = vadd.f32 %v1823_v2, %v1822_v47  ;;  %v1997_v26 = vrot.slane %v1910_v11, 6 }
 0x68f   :  { %v1732_v25 = vadd.f32 %v1722_v18, %v3027_v37  ;;  %v3302_v37 = vadd.f32 %v3223_v29, %v1944_v44  ;;  %v1830_v18 = vadd.f32 %v1829_v5, %v1828_v12  ;;  %v1895_v44 = vmul.f32 %v3227_v31, %v1812_v13 }
 0x690   :  { %v1834_v57 = vadd.f32 %v1833_v20, %v1832_v10  ;;  %v1925_v23 = vmul.f32 %v1924_v42, %v1824_v14 }
 0x691   :  { %v1796_v21 = vmul.f32 %v1782_v56, %v1732_v25  ;;  %v1949_v60 = vsel %vm3306_vm9, %v3223_v29, %v3302_v37  ;;  %v1982_v25 = vand.u32 2147483648, %v3216_v32  ;;  %v1980_v56 = vand.u32 2147483647, %v3216_v32 }
 0x692   :  { %v1835_v8 = vrot.slane %v1834_v57, 1  ;;  %v1940_v31 = vmul.f32 %v1939_v50, %v1830_v18  ;;  %v1954_v20 = vsel %vm3325_vm13, %v1953_v16, %v1949_v60  ;;  %v1880_v37 = vmul.f32 %v3220_v48, %v3304_v39 }
 0x693   :  { %v1837_v27 = vrot.slane %v1796_v21, 4  ;;  %v1983_v36 = vor.u32 1.1754944e-38, %v1982_v25  ;;  %v1979_v32 = vsel %vm3355_vm10, %v3263_v38, %v1975_v22  ;;  %vm1981_vm4 = vcmp.eq.f32.partialorder %v1980_v56, 8.507059e+37 }
 0x694   :  { %v1723_v55 = vpop.f32.mrf.mxu1  ;;  %v1836_v24 = vadd.f32 %v1835_v8, %v1834_v57  ;;  %v2003_v12 = vrot.slane %v1940_v31, 4  ;;  %vm2013_vm9 = vcmask 1047559  }
 0x695   :  { %v1838_v58 = vadd.f32 %v1837_v27, %v1796_v21  ;;  %v1724_v59 = vadd.f32 %v3140_v54, %v1723_v55  ;;  %v1965_v54 = vand.u32 2147483647, %v3205_v3  ;;  %v2000_v27 = vrot.slane %v1925_v23, 5 }
 0x696   :  { %v1955_v21 = vmul.f32 %v1954_v20, %v1836_v24  ;;  %v1984_v39 = vsel %vm1981_vm4, %v1983_v36, %v1979_v32 }
 0x697   :  { %v1839_v53 = vrot.slane %v1838_v58, 2  ;;  %v1733_v63 = vadd.f32 %v1724_v59, %v3033_v40  ;;  %v1960_v40 = vadd.f32 %v3259_v62, %v1959_v61  ;;  %vm3337_vm15 = vcmp.eq.f32.partialorder %v1965_v54, 8.507059e+37 }
 0x698   :  { %v2006_v28 = vrot.slane %v1955_v21, 3 }
 0x699   :  { %v1840_v29 = vadd.f32 %v1839_v53, %v1838_v58  ;;  %v1797_v1 = vmul.f32 %v1789_v35, %v1733_v63  ;;  %v1964_v6 = vsel %vm3332_vm14, %v3259_v62, %v1960_v40  ;;  %v1994_v62 = vrot.slane %v1895_v44, 7 }
 0x69a   :  { %v1969_v41 = vsel %vm3337_vm15, %v1968_v51, %v1964_v6 }
 0x69b   :  { %v1841_v4 = vrot.slane %v1840_v29, 1  ;;  %v1843_v10 = vrot.slane %v1797_v1, 4  ;;  %v1996_v50 = vsel %vm1995_vm2, %v1994_v62, %v1880_v37 }
 0x69c   :  { %v1999_v55 = vsel %vm1998_vm3, %v1997_v26, %v1996_v50 }
 0x69d   :  { %v1844_v3 = vadd.f32 %v1843_v10, %v1797_v1  ;;  %v1842_v49 = vadd.f32 %v1841_v4, %v1840_v29  ;;  %v2002_v57 = vsel %vm2001_vm5, %v2000_v27, %v1999_v55 }
 0x69e   :  { %v2005_v38 = vsel %vm2004_vm6, %v2003_v12, %v2002_v57 }
 0x69f   :  { %v1845_v19 = vrot.slane %v1844_v3, 2  ;;  %v1970_v47 = vmul.f32 %v1969_v41, %v1842_v49  ;;  %v2008_v58 = vsel %vm2007_vm7, %v2006_v28, %v2005_v38 }
 0x6a1   :  { %v1846_v42 = vadd.f32 %v1845_v19, %v1844_v3  ;;  %v2009_v48 = vrot.slane %v1970_v47, 2 }
 0x6a3   :  { %v1847_v0 = vrot.slane %v1846_v42, 1  ;;  %v2011_v33 = vsel %vm2010_vm8, %v2009_v48, %v2008_v58 }
 0x6a5   :  { %v1848_v46 = vadd.f32 %v1847_v0, %v1846_v42 }
 0x6a7   :  { %v1985_v52 = vmul.f32 %v1984_v39, %v1848_v46 }
 0x6a9   :  { %v2012_v59 = vrot.slane %v1985_v52, 1 }
 0x6ab   :  { %v2014_v60 = vsel %vm2013_vm9, %v2012_v59, %v2011_v33 }
 0x6ac   :  { %2016 = vst [vmem:[#allocation14] sm:$0xff] %v2014_v60 }
 0x6ad   :  { %2027 = dma.vmem_to_hbm [thread:$0]  %s2023_s20, 128, %s2025_s23, [#allocation4]  }
 0x6ae   :  { %2632 = dma.done.wait [#allocation4], 128  }
 0x6af   :  { %2633 = vsyncadd [#allocation4], 4294967168 }
 0x6b0   :  { %2032 = vsyncpa [#allocation3], 1 }
 0x6b1   :  { %2033 = vsyncpa [#allocation6], 1 }
 0x6b2   :  { %2034 = vsyncpa [#allocation9], 1 }
 0x6b3   :  { %2035 = vsyncpa [#allocation12], 1 }
 0x6b4   :  { %2036 = vsyncpa [#allocation4], 1 }

</bundles_post_ra>
